<compile_context>
chip_gen: v5e
topology: v5e:2x2
jax: 0.10.0
libtpu: 0.0.40
codegen_flags: <defaults>
</compile_context>

<pallas_src>
import math

import jax
import jax.numpy as jnp
from jax.experimental import pallas as pl
from jax.experimental.pallas import tpu as pltpu


# ----------------------------------------------------------------------------
# Fused kernel: projections + multi-head attention + output projection
# ----------------------------------------------------------------------------
def _make_fused_kernel(n_head, scale):
    def kernel(k_ref, q_ref, v_ref, wk_ref, bk_ref, wq_ref, bq_ref,
               wc_ref, bc_ref, o_ref):
        # One batch element per grid step.  Blocks are (1, T, C); index [0]
        # drops the leading singleton.
        k = k_ref[0]                      # (T_v, C)
        q = q_ref[0]                      # (T_q, C)
        v = v_ref[0]                      # (T_v, C)
        T_v, C = k.shape
        T_q = q.shape[0]
        hd = C // n_head

        # --- projections on the MXU (full-C operands) ---
        kp = jnp.dot(k, wk_ref[...],
                     preferred_element_type=jnp.float32) + bk_ref[...]
        qp = jnp.dot(q, wq_ref[...],
                     preferred_element_type=jnp.float32) + bq_ref[...]
        # Fold 1/sqrt(hd) into the small (T_q, C) tile instead of the scores.
        qp = qp * scale

        # --- head split in-VMEM: (T, C) -> (nh, T, hd) ---
        qh = qp.reshape(T_q, n_head, hd).transpose(1, 0, 2)
        kh = kp.reshape(T_v, n_head, hd).transpose(1, 0, 2)
        vh = v.astype(jnp.float32).reshape(T_v, n_head, hd).transpose(1, 0, 2)

        # --- attention, batched over heads ---
        att = jnp.einsum("hqd,hkd->hqk", qh, kh,
                         preferred_element_type=jnp.float32)
        att = att - jnp.max(att, axis=-1, keepdims=True)
        e = jnp.exp(att)
        p = e * pl.reciprocal(jnp.sum(e, axis=-1, keepdims=True), approx=True)
        y = jnp.einsum("hqk,hkd->hqd", p, vh,
                       preferred_element_type=jnp.float32)   # (nh, T_q, hd)

        # --- merge heads and output projection (lane-dense (T_q, C) store) ---
        y = y.transpose(1, 0, 2).reshape(T_q, C)
        out = jnp.dot(y, wc_ref[...],
                      preferred_element_type=jnp.float32) + bc_ref[...]
        o_ref[0] = out.astype(o_ref.dtype)

    return kernel


# ----------------------------------------------------------------------------
# Wrapper
# ----------------------------------------------------------------------------
def cross_attention(k, q, v, wq, bq, wk, bk, wc, bc, n_head=16):
    """Pallas implementation of CrossAttention.forward(k, q, v).

    k, v: (B, T_v, C); q: (B, T_q, C); weights in x @ W orientation.
    """
    B, T_v, C = v.shape
    _, T_q, _ = q.shape
    hd = C // n_head
    scale = 1.0 / math.sqrt(hd)

    kernel = _make_fused_kernel(n_head, scale)
    weight_spec = pl.BlockSpec((C, C), lambda b: (0, 0))
    bias_spec = pl.BlockSpec((1, C), lambda b: (0, 0))

    return pl.pallas_call(
        kernel,
        out_shape=jax.ShapeDtypeStruct((B, T_q, C), q.dtype),
        grid=(B,),
        in_specs=[
            pl.BlockSpec((1, T_v, C), lambda b: (b, 0, 0)),   # k
            pl.BlockSpec((1, T_q, C), lambda b: (b, 0, 0)),   # q
            pl.BlockSpec((1, T_v, C), lambda b: (b, 0, 0)),   # v
            weight_spec, bias_spec,                           # wk, bk
            weight_spec, bias_spec,                           # wq, bq
            weight_spec, bias_spec,                           # wc, bc
        ],
        out_specs=pl.BlockSpec((1, T_q, C), lambda b: (b, 0, 0)),
        compiler_params=pltpu.CompilerParams(
            dimension_semantics=("parallel",)),
    )(k, q, v,
      wk, bk.reshape(1, C),
      wq, bq.reshape(1, C),
      wc, bc.reshape(1, C))


# ----------------------------------------------------------------------------
# Pure-JAX reference (for correctness check)
# ----------------------------------------------------------------------------
def reference(k, q, v, wq, bq, wk, bk, wc, bc, n_head=16):
    B, T_v, C = v.shape
    T_q = q.shape[1]
    hd = C // n_head
    kp = k @ wk + bk
    qp = q @ wq + bq
    kh = kp.reshape(B, T_v, n_head, hd).transpose(0, 2, 1, 3)
    qh = qp.reshape(B, T_q, n_head, hd).transpose(0, 2, 1, 3)
    vh = v.reshape(B, T_v, n_head, hd).transpose(0, 2, 1, 3)
    att = jnp.einsum("bhtd,bhsd->bhts", qh, kh) * (1.0 / math.sqrt(hd))
    att = jax.nn.softmax(att, axis=-1)
    y = jnp.einsum("bhts,bhsd->bhtd", att, vh)
    y = y.transpose(0, 2, 1, 3).reshape(B, T_q, C)
    return y @ wc + bc


# ----------------------------------------------------------------------------
if __name__ == "__main__":
    B, T_q, T_v, C, NH = 2, 8, 8, 128, 16  # forward() forces n_head = 16

    key = jax.random.PRNGKey(0)
    ks = jax.random.split(key, 9)

    k_in = jax.random.normal(ks[0], (B, T_v, C), jnp.float32)
    q_in = jax.random.normal(ks[1], (B, T_q, C), jnp.float32)
    v_in = jax.random.normal(ks[2], (B, T_v, C), jnp.float32)

    # Deterministic Linear params (PyTorch-style uniform init), stored in
    # x @ W orientation (i.e. transposed vs. nn.Linear.weight).
    bound = 1.0 / math.sqrt(C)
    wq = jax.random.uniform(ks[3], (C, C), jnp.float32, -bound, bound)
    bq = jax.random.uniform(ks[4], (C,), jnp.float32, -bound, bound)
    wk = jax.random.uniform(ks[5], (C, C), jnp.float32, -bound, bound)
    bk = jax.random.uniform(ks[6], (C,), jnp.float32, -bound, bound)
    wc = jax.random.uniform(ks[7], (C, C), jnp.float32, -bound, bound)
    bc = jax.random.uniform(ks[8], (C,), jnp.float32, -bound, bound)
    # Note: c_attn and v_proj exist in __init__ but are unused in forward().

    out = cross_attention(k_in, q_in, v_in, wq, bq, wk, bk, wc, bc, n_head=NH)
    out = jax.block_until_ready(out)

    ref = reference(k_in, q_in, v_in, wq, bq, wk, bk, wc, bc, n_head=NH)
    assert out.shape == (B, T_q, C)
    # Tolerance loosened slightly vs. exact divide because the softmax
    # denominator uses the EUP approximate reciprocal (rel. err ~2^-12).
    assert jnp.allclose(out, ref, rtol=2e-3, atol=2e-3), "mismatch vs reference"

    print("KERNEL_OK")
</pallas_src>

<mosaic_0001>
module attributes {stable_mosaic.version = 11 : i64} {
  func.func @kernel(%arg0: i32, %arg1: memref<1x8x128xf32, #tpu.memory_space<vmem>>, %arg2: memref<1x8x128xf32, #tpu.memory_space<vmem>>, %arg3: memref<1x8x128xf32, #tpu.memory_space<vmem>>, %arg4: memref<128x128xf32, #tpu.memory_space<vmem>>, %arg5: memref<1x128xf32, #tpu.memory_space<vmem>>, %arg6: memref<128x128xf32, #tpu.memory_space<vmem>>, %arg7: memref<1x128xf32, #tpu.memory_space<vmem>>, %arg8: memref<128x128xf32, #tpu.memory_space<vmem>>, %arg9: memref<1x128xf32, #tpu.memory_space<vmem>>, %arg10: memref<1x8x128xf32, #tpu.memory_space<vmem>>) attributes {dimension_semantics = [#tpu.dimension_semantics<parallel>], iteration_bounds = array<i64: 2>, scalar_prefetch = 0 : i64, scratch_operands = 0 : i64, tpu.core_type = #tpu.core_type<tc>, window_params = [{transform_indices = @transform_0, window_bounds = array<i64: 1, 8, 128>}, {transform_indices = @transform_1, window_bounds = array<i64: 1, 8, 128>}, {transform_indices = @transform_2, window_bounds = array<i64: 1, 8, 128>}, {pipeline_mode = #tpu.pipeline_mode<synchronous>, transform_indices = @transform_3, window_bounds = array<i64: 128, 128>}, {pipeline_mode = #tpu.pipeline_mode<synchronous>, transform_indices = @transform_4, window_bounds = array<i64: 1, 128>}, {pipeline_mode = #tpu.pipeline_mode<synchronous>, transform_indices = @transform_5, window_bounds = array<i64: 128, 128>}, {pipeline_mode = #tpu.pipeline_mode<synchronous>, transform_indices = @transform_6, window_bounds = array<i64: 1, 128>}, {pipeline_mode = #tpu.pipeline_mode<synchronous>, transform_indices = @transform_7, window_bounds = array<i64: 128, 128>}, {pipeline_mode = #tpu.pipeline_mode<synchronous>, transform_indices = @transform_8, window_bounds = array<i64: 1, 128>}, {transform_indices = @transform_9, window_bounds = array<i64: 1, 8, 128>}]} {
    %c0 = arith.constant 0 : index
    %c0_0 = arith.constant 0 : index
    %c0_1 = arith.constant 0 : index
    %0 = vector.load %arg1[%c0, %c0_0, %c0_1] : memref<1x8x128xf32, #tpu.memory_space<vmem>>, vector<1x8x128xf32>
    %1 = vector.shape_cast %0 : vector<1x8x128xf32> to vector<8x128xf32>
    %c0_2 = arith.constant 0 : index
    %c0_3 = arith.constant 0 : index
    %c0_4 = arith.constant 0 : index
    %2 = vector.load %arg2[%c0_2, %c0_3, %c0_4] : memref<1x8x128xf32, #tpu.memory_space<vmem>>, vector<1x8x128xf32>
    %3 = vector.shape_cast %2 : vector<1x8x128xf32> to vector<8x128xf32>
    %c0_5 = arith.constant 0 : index
    %c0_6 = arith.constant 0 : index
    %c0_7 = arith.constant 0 : index
    %4 = vector.load %arg3[%c0_5, %c0_6, %c0_7] : memref<1x8x128xf32, #tpu.memory_space<vmem>>, vector<1x8x128xf32>
    %5 = vector.shape_cast %4 : vector<1x8x128xf32> to vector<8x128xf32>
    %c0_8 = arith.constant 0 : index
    %c0_9 = arith.constant 0 : index
    %6 = vector.load %arg4[%c0_8, %c0_9] : memref<128x128xf32, #tpu.memory_space<vmem>>, vector<128x128xf32>
    %cst = arith.constant dense<0.000000e+00> : vector<8x128xf32>
    %7 = tpu.matmul %1, %6, %cst {dimension_numbers = #tpu.dot_dimension_numbers<[1], [0], [0], [1], [0, 0, 1, 1], [], []>} : vector<8x128xf32>, vector<128x128xf32>, vector<8x128xf32> -> vector<8x128xf32>
    %c0_10 = arith.constant 0 : index
    %c0_11 = arith.constant 0 : index
    %8 = vector.load %arg5[%c0_10, %c0_11] : memref<1x128xf32, #tpu.memory_space<vmem>>, vector<1x128xf32>
    %9 = vector.broadcast %8 : vector<1x128xf32> to vector<8x128xf32>
    %10 = arith.addf %7, %9 : vector<8x128xf32>
    %c0_12 = arith.constant 0 : index
    %c0_13 = arith.constant 0 : index
    %11 = vector.load %arg6[%c0_12, %c0_13] : memref<128x128xf32, #tpu.memory_space<vmem>>, vector<128x128xf32>
    %cst_14 = arith.constant dense<0.000000e+00> : vector<8x128xf32>
    %12 = tpu.matmul %3, %11, %cst_14 {dimension_numbers = #tpu.dot_dimension_numbers<[1], [0], [0], [1], [0, 0, 1, 1], [], []>} : vector<8x128xf32>, vector<128x128xf32>, vector<8x128xf32> -> vector<8x128xf32>
    %c0_15 = arith.constant 0 : index
    %c0_16 = arith.constant 0 : index
    %13 = vector.load %arg7[%c0_15, %c0_16] : memref<1x128xf32, #tpu.memory_space<vmem>>, vector<1x128xf32>
    %14 = vector.broadcast %13 : vector<1x128xf32> to vector<8x128xf32>
    %15 = arith.addf %12, %14 : vector<8x128xf32>
    %cst_17 = arith.constant 0.353553385 : f32
    %16 = vector.broadcast %cst_17 : f32 to vector<8x128xf32>
    %17 = arith.mulf %15, %16 : vector<8x128xf32>
    %18 = vector.shape_cast %17 : vector<8x128xf32> to vector<8x16x8xf32>
    %19 = tpu.transpose %18, [1, 0, 2] : vector<8x16x8xf32> -> vector<16x8x8xf32>
    %20 = vector.shape_cast %10 : vector<8x128xf32> to vector<8x16x8xf32>
    %21 = tpu.transpose %20, [1, 0, 2] : vector<8x16x8xf32> -> vector<16x8x8xf32>
    %22 = vector.shape_cast %5 : vector<8x128xf32> to vector<8x16x8xf32>
    %23 = tpu.transpose %22, [1, 0, 2] : vector<8x16x8xf32> -> vector<16x8x8xf32>
    "tpu.trace_start"() <{level = 10 : i32, message = "hqd,hkd->hqk"}> : () -> ()
    %cst_18 = arith.constant dense<0.000000e+00> : vector<16x8x8xf32>
    %24 = tpu.matmul %19, %21, %cst_18 {dimension_numbers = #tpu.dot_dimension_numbers<[2], [2], [1], [1], [0, 0, 0, 1, 1, 1], [0], [0]>} : vector<16x8x8xf32>, vector<16x8x8xf32>, vector<16x8x8xf32> -> vector<16x8x8xf32>
    "tpu.trace_stop"() : () -> ()
    %cst_19 = arith.constant dense<0xFF800000> : vector<16x8xf32>
    %25 = vector.multi_reduction <maximumf>, %24, %cst_19 [2] : vector<16x8x8xf32> to vector<16x8xf32>
    %26 = vector.shape_cast %25 : vector<16x8xf32> to vector<16x8x1xf32>
    %27 = vector.broadcast %26 : vector<16x8x1xf32> to vector<16x8x8xf32>
    %28 = arith.subf %24, %27 : vector<16x8x8xf32>
    %29 = math.exp %28 : vector<16x8x8xf32>
    %cst_20 = arith.constant dense<0.000000e+00> : vector<16x8xf32>
    %30 = vector.multi_reduction <add>, %29, %cst_20 [2] : vector<16x8x8xf32> to vector<16x8xf32>
    %31 = vector.shape_cast %30 : vector<16x8xf32> to vector<16x8x1xf32>
    %32 = tpu.reciprocal %31 {approx = true} : vector<16x8x1xf32> -> vector<16x8x1xf32>
    %33 = vector.broadcast %32 : vector<16x8x1xf32> to vector<16x8x8xf32>
    %34 = arith.mulf %29, %33 : vector<16x8x8xf32>
    "tpu.trace_start"() <{level = 10 : i32, message = "hqk,hkd->hqd"}> : () -> ()
    %cst_21 = arith.constant dense<0.000000e+00> : vector<16x8x8xf32>
    %35 = tpu.matmul %34, %23, %cst_21 {dimension_numbers = #tpu.dot_dimension_numbers<[2], [1], [1], [2], [0, 0, 0, 1, 1, 2], [0], [0]>} : vector<16x8x8xf32>, vector<16x8x8xf32>, vector<16x8x8xf32> -> vector<16x8x8xf32>
    "tpu.trace_stop"() : () -> ()
    %36 = tpu.transpose %35, [1, 0, 2] : vector<16x8x8xf32> -> vector<8x16x8xf32>
    %37 = vector.shape_cast %36 : vector<8x16x8xf32> to vector<8x128xf32>
    %c0_22 = arith.constant 0 : index
    %c0_23 = arith.constant 0 : index
    %38 = vector.load %arg8[%c0_22, %c0_23] : memref<128x128xf32, #tpu.memory_space<vmem>>, vector<128x128xf32>
    %cst_24 = arith.constant dense<0.000000e+00> : vector<8x128xf32>
    %39 = tpu.matmul %37, %38, %cst_24 {dimension_numbers = #tpu.dot_dimension_numbers<[1], [0], [0], [1], [0, 0, 1, 1], [], []>} : vector<8x128xf32>, vector<128x128xf32>, vector<8x128xf32> -> vector<8x128xf32>
    %c0_25 = arith.constant 0 : index
    %c0_26 = arith.constant 0 : index
    %40 = vector.load %arg9[%c0_25, %c0_26] : memref<1x128xf32, #tpu.memory_space<vmem>>, vector<1x128xf32>
    %41 = vector.broadcast %40 : vector<1x128xf32> to vector<8x128xf32>
    %42 = arith.addf %39, %41 : vector<8x128xf32>
    %c0_27 = arith.constant 0 : index
    %c0_28 = arith.constant 0 : index
    %c0_29 = arith.constant 0 : index
    %43 = vector.load %arg10[%c0_27, %c0_28, %c0_29] : memref<1x8x128xf32, #tpu.memory_space<vmem>>, vector<1x8x128xf32>
    %44 = vector.shape_cast %43 : vector<1x8x128xf32> to vector<8x128xf32>
    %45 = vector.shape_cast %42 : vector<8x128xf32> to vector<1x8x128xf32>
    tpu.vector_store %arg10[%c0_27, %c0_28, %c0_29], %45 {strides = array<i32>} : memref<1x8x128xf32, #tpu.memory_space<vmem>>, vector<1x8x128xf32>,
    return
  }
  func.func @transform_0(%arg0: i32) -> (i32, i32, i32) {
    %c0_i32 = arith.constant 0 : i32
    %c0_i32_0 = arith.constant 0 : i32
    %c0_i32_1 = arith.constant 0 : i32
    return %arg0, %c0_i32, %c0_i32_0 : i32, i32, i32
  }
  func.func @transform_1(%arg0: i32) -> (i32, i32, i32) {
    %c0_i32 = arith.constant 0 : i32
    %c0_i32_0 = arith.constant 0 : i32
    %c0_i32_1 = arith.constant 0 : i32
    return %arg0, %c0_i32, %c0_i32_0 : i32, i32, i32
  }
  func.func @transform_2(%arg0: i32) -> (i32, i32, i32) {
    %c0_i32 = arith.constant 0 : i32
    %c0_i32_0 = arith.constant 0 : i32
    %c0_i32_1 = arith.constant 0 : i32
    return %arg0, %c0_i32, %c0_i32_0 : i32, i32, i32
  }
  func.func @transform_3(%arg0: i32) -> (i32, i32) {
    %c0_i32 = arith.constant 0 : i32
    %c0_i32_0 = arith.constant 0 : i32
    %c0_i32_1 = arith.constant 0 : i32
    return %c0_i32, %c0_i32_0 : i32, i32
  }
  func.func @transform_4(%arg0: i32) -> (i32, i32) {
    %c0_i32 = arith.constant 0 : i32
    %c0_i32_0 = arith.constant 0 : i32
    %c0_i32_1 = arith.constant 0 : i32
    return %c0_i32, %c0_i32_0 : i32, i32
  }
  func.func @transform_5(%arg0: i32) -> (i32, i32) {
    %c0_i32 = arith.constant 0 : i32
    %c0_i32_0 = arith.constant 0 : i32
    %c0_i32_1 = arith.constant 0 : i32
    return %c0_i32, %c0_i32_0 : i32, i32
  }
  func.func @transform_6(%arg0: i32) -> (i32, i32) {
    %c0_i32 = arith.constant 0 : i32
    %c0_i32_0 = arith.constant 0 : i32
    %c0_i32_1 = arith.constant 0 : i32
    return %c0_i32, %c0_i32_0 : i32, i32
  }
  func.func @transform_7(%arg0: i32) -> (i32, i32) {
    %c0_i32 = arith.constant 0 : i32
    %c0_i32_0 = arith.constant 0 : i32
    %c0_i32_1 = arith.constant 0 : i32
    return %c0_i32, %c0_i32_0 : i32, i32
  }
  func.func @transform_8(%arg0: i32) -> (i32, i32) {
    %c0_i32 = arith.constant 0 : i32
    %c0_i32_0 = arith.constant 0 : i32
    %c0_i32_1 = arith.constant 0 : i32
    return %c0_i32, %c0_i32_0 : i32, i32
  }
  func.func @transform_9(%arg0: i32) -> (i32, i32, i32) {
    %c0_i32 = arith.constant 0 : i32
    %c0_i32_0 = arith.constant 0 : i32
    %c0_i32_1 = arith.constant 0 : i32
    return %arg0, %c0_i32, %c0_i32_0 : i32, i32, i32
  }
}

</mosaic_0001>

<bundles_post_ra>
// kernel: tpu_custom_call.1
= control target key start
LH: loop header
LB: loop body
LE: loop exit
PB: predicated region body
PF: predicated region fallthrough
CT: control target
= control target key end

     0   :  { %s6004_s0 = inlined_call_operand.hbm [shape: f32[2,8,128], index: 0, kind: input, shape index: {}]   ;;  %s6005_s1 = inlined_call_operand.hbm [shape: f32[2,8,128], index: 1, kind: input, shape index: {}]   ;;  %s6006_s2 = inlined_call_operand.hbm [shape: f32[2,8,128], index: 2, kind: input, shape index: {}]   ;;  %s6007_s3 = inlined_call_operand.hbm [shape: f32[128,128], index: 3, kind: input, shape index: {}]   ;;  %s6008_s4 = inlined_call_operand.vmem [shape: f32[1,128], index: 4, kind: input, shape index: {}]   ;;  %s6009_s5 = inlined_call_operand.hbm [shape: f32[128,128], index: 5, kind: input, shape index: {}]   ;;  %s6010_s6 = inlined_call_operand.vmem [shape: f32[1,128], index: 6, kind: input, shape index: {}]   ;;  %s6011_s7 = inlined_call_operand.hbm [shape: f32[128,128], index: 7, kind: input, shape index: {}]   ;;  %s6012_s8 = inlined_call_operand.vmem [shape: f32[1,128], index: 8, kind: input, shape index: {}]   ;;  %s6013_s9 = inlined_call_operand.hbm [shape: f32[2,8,128], index: 9, kind: output, shape index: {}]  }
   0x1   :  { %6027 = sst [smem:[#allocation25_spill]] %s6005_s1 }
   0x2   :  { %6028 = sst [smem:[#allocation26_spill]] %s6007_s3 }
   0x3   :  { %6029 = sst [smem:[#allocation27_spill]] %s6012_s8 }
   0x4   :  { %14 = vsyncpa [#allocation3], 0 }
   0x5   :  { %16 = vsyncpa [#allocation3 + $0x1], 0 }
   0x6   :  { %17 = vsyncpa [#allocation6], 0 }
   0x7   :  { %19 = vsyncpa [#allocation6 + $0x1], 0 }
   0x8   :  { %20 = vsyncpa [#allocation9], 0 }
   0x9   :  { %21 = vsyncpa [#allocation12], 0 }
   0xa   :  { %22 = vsyncpa [#allocation4], 0 }
   0xb   :  { %24 = vsyncpa [#allocation4 + $0x1], 0  ;;  %s4317_s30 = smov 0   ;;  %s4319_s10 = smov 0  }
   0xc   :  { %s4321_s11 = smov 0   ;;  %s4323_s12 = smov 0  }
   0xd LB: > { %6030 = sst [smem:[#allocation19_spill]] %s4231_s30  ;;  %s4341_s16 = sadd.s32 4294967295, %s4243_s12   ;;  %s4243_s12 = sphi %s4323_s12, %s6057_s12   ;;  %s4239_s11 = sphi %s4321_s11, %s6061_s11   ;;  %s4235_s10 = sphi %s4319_s10, %s6060_s10   ;;  %s4231_s30 = sphi %s4317_s30, %s6059_s30  }
   0xe   : > { %6031 = sst [smem:[#allocation20_spill]] %s4243_s12  ;;  %p3740_p0 = scmp.ge.s32.totalorder %s4243_s12, 1 }
   0xf   : > { %s6032_s3 = sld [smem:[#allocation26_spill]]  ;;  %p6026_p1 = scmp.eq.s32.totalorder %s4341_s16, 0 }
  0x10   : > { %p265_p2 = scmp.lt.s32.totalorder %s4243_s12, 3  ;;  %s4245_s18 = smov [#allocation8]  }
  0x11   : > { %s278_s19 = sshll.u32 %s4245_s18, 4  ;;  %s6014_s21 = smov 128   ;;  %s279_s19 = int_to_ptr.vmem [resolvable:$true] %s278_s19 }
  0x12   : > { %p4346_p3 = pnand %p3740_p0, %p265_p2  ;;  %s6016_s22 = smov 8  }
  0x13   : > { %s3739_s23 = sadd.s32 4294967294, %s4243_s12   ;;  %s4366_s24 = sadd.s32 1, %s4243_s12  }
  0x14   : > { %p3831_p4 = pneg %p4346_p3  ;;  %6035 = sst [smem:[#allocation21_spill]] %s4366_s24 }
  0x15   : > { %s276_s15 = sshll.u32 %s6032_s3, 4  ;;  %s37_s25 = sadd.s32 1, %s4239_s11  ;;  %s277_s15 = int_to_ptr.hbm [resolvable:$true] %s276_s15 }
  0x16   : > { %p4355_p6 = pnand %p3831_p4, %p6026_p1  ;;  %s34_s26 = ssub.s32 %s4243_s12, %s4366_s24 }
  0x17   : > { %p44_p7 = scmp.ne.s32.totalorder %s4239_s11, %s4235_s10  ;;  %p35_p8 = scmp.eq.s32.totalorder %s34_s26, 0 }
  0x18   : > { %3834 = dma.hbm_to_vmem [thread:$0]  (!%p4355_p6), %s277_s15, 2048, %s279_s19, [#allocation9], %s6014_s21, %s6014_s21, %s6016_s22  }
  0x19   : > { %p45_p9 = scmp.eq.s32.totalorder %s4243_s12, 0  ;;  %p50_p10 = scmp.ne.s32.totalorder %s4235_s10, %s4231_s30 }
  0x1a   : > { %p252_p11 = scmp.eq.s32.totalorder %s4341_s16, 1  ;;  %p258_p2 = scmp.eq.s32.totalorder %s3739_s23, 1 }
  0x1b   : > { %s4378_s27 = scalar_select %p35_p8, %s4239_s11, %s37_s25  }
  0x1c   : > { %p46_p12 = por %p45_p9, %p44_p7  ;;  %p4382_p13 = por %p6026_p1, %p50_p10 }
  0x1d   : > { %6036 = sst [smem:[#allocation22_spill]] %s4378_s27  ;;  %p4386_p0 = por %p252_p11, %p44_p7 }
  0x1e   : > { %p3858_p4 = scmp.lt.s32.totalorder %s4243_s12, 2  ;;  %s6018_s13 = sand.u32 1, %s4239_s11  }
  0x1f   : > { %s6038_s29 = scalar_select %p4386_p0, 1, 0 }
  0x20   : > { %p4392_p5 = por %p258_p2, %p50_p10  ;;  %s4398_s15 = sshll.u32 %s6018_s13, 3 }
  0x21   : > { %6039 = sst [smem:[#allocation23_spill]] %s6038_s29  ;;  %s4401_s18 = sshll.u32 %s4243_s12, 3 }
  0x22   : > { %s6040_s14 = scalar_select %p4392_p5, 1, 0 }
  0x23   : > { %p4403_p8 = pnand %p3858_p4, %p46_p12  ;;  %s348_s23 = sand.u32 1, %s4243_s12  }
  0x24   : > { %6041 = sst [smem:[#allocation24_spill]] %s6040_s14  ;;  %s352_s22 = scalar_lea.vmem [#allocation5], %s4398_s15 }
  0x25   : > { %s6043_s1 = sld [smem:[#allocation25_spill]]  ;;  %s360_s3 = sshll.u32 %s352_s22, 4  ;;  %s361_s3 = int_to_ptr.vmem [resolvable:$true] %s360_s3 }
  0x26   : > { %s293_s14 = sshll.u32 %s6009_s5, 4  ;;  %s4416_s30 = scalar_lea.sflag [#allocation6], %s348_s23  ;;  %s294_s14 = int_to_ptr.hbm [resolvable:$true] %s293_s14 }
  0x27   : > { %p4019_p9 = pneg %p4403_p8 }
  0x2b   : > { %s356_s21 = scalar_lea.hbm %s6043_s1, %s4401_s18  ;;  %s4022_s25 = scalar_lea.hbm %s6043_s1, 16 }
  0x2c   : > { %s358_s27 = sshll.u32 %s356_s21, 4  ;;  %s359_s27 = int_to_ptr.hbm [resolvable:$true] %s358_s27 }
  0x2d   : > { %s4015_s8 = sshra.s32 %s359_s27, 4  ;;  %s4016_s8 = int_to_ptr.hbm [resolvable:$true] %s4015_s8 }
  0x2e   : > { %s4017_s29 = scalar_lea.hbm %s4016_s8, 8  ;;  %p4023_p12 = scmp.lt.s32.totalorder %s4016_s8, %s6043_s1 }
  0x2f   : > { %p4018_p7 = scmp.ne.s32.totalorder %s4016_s8, %s4017_s29  ;;  %p4024_p2 = scmp.lt.s32.totalorder %s4022_s25, %s4017_s29 }
  0x31   : > { %p4020_p10 = pnand %p4019_p9, %p4018_p7  ;;  %p4025_p4 = por %p4024_p2, %p4023_p12 }
  0x33   : > { %p4021_p11 = pneg %p4020_p10 }
  0x35   : > { %p4026_p1 = pnand %p4025_p4, %p4021_p11 }
  0x37   : > { %4029 = shalt.err (!%p4026_p1)
}
  0x38   : > { %3847 = dma.hbm_to_vmem [thread:$0]  (!%p4403_p8), %s359_s27, 128, %s361_s3, %s4416_s30  }
  0x39   : > { %s4248_s24 = smov [#allocation10]   ;;  %s310_s8 = sshll.u32 %s6011_s7, 4  ;;  %s311_s8 = int_to_ptr.hbm [resolvable:$true] %s310_s8 }
  0x3a   : > { %s295_s13 = sshll.u32 %s4248_s24, 4  ;;  %s6044_s12 = smov 8   ;;  %s296_s13 = int_to_ptr.vmem [resolvable:$true] %s295_s13 }
  0x3b   : > { %s6045_s29 = smov 128   ;;  %s4249_s21 = smov [#allocation11]  }
  0x3c   : > { %3837 = dma.hbm_to_vmem [thread:$0]  (!%p4355_p6), %s294_s14, 2048, %s296_s13, [#allocation9], %s6045_s29, %s6045_s29, %s6044_s12  }
  0x3d   : > { %s312_s25 = sshll.u32 %s4249_s21, 4  ;;  %s337_s26 = scalar_lea.hbm %s6004_s0, %s4401_s18  ;;  %s313_s25 = int_to_ptr.vmem [resolvable:$true] %s312_s25 }
  0x3e   : > { %3840 = dma.hbm_to_vmem [thread:$0]  (!%p4355_p6), %s311_s8, 2048, %s313_s25, [#allocation12], %s6045_s29, %s6045_s29, %s6044_s12  }
  0x3f   : > { %s339_s24 = sshll.u32 %s337_s26, 4  ;;  %s333_s23 = scalar_lea.vmem [#allocation2], %s4398_s15  ;;  %s340_s24 = int_to_ptr.hbm [resolvable:$true] %s339_s24 }
  0x40   : > { %s341_s22 = sshll.u32 %s333_s23, 4  ;;  %s6046_s1 = sand.u32 1, %s4239_s11   ;;  %s342_s22 = int_to_ptr.vmem [resolvable:$true] %s341_s22 }
  0x41   : > { %s330_s14 = scalar_lea.sflag [#allocation3], %s6046_s1  ;;  %s4105_s13 = sshra.s32 %s340_s24, 4  ;;  %s4106_s13 = int_to_ptr.hbm [resolvable:$true] %s4105_s13 }
  0x42   : > { %s4107_s21 = scalar_lea.hbm %s4106_s13, 8  ;;  %s4112_s27 = scalar_lea.hbm %s6004_s0, 16 }
  0x43   : > { %p4108_p1 = scmp.ne.s32.totalorder %s4106_s13, %s4107_s21  ;;  %p4113_p6 = scmp.lt.s32.totalorder %s4106_s13, %s6004_s0 }
  0x44   : > { %p4114_p11 = scmp.lt.s32.totalorder %s4112_s27, %s4107_s21 }
  0x45   : > { %p4110_p7 = pnand %p4108_p1, %p4019_p9 }
  0x46   : > { %p4115_p12 = por %p4114_p11, %p4113_p6 }
  0x47   : > { %p4111_p10 = pneg %p4110_p7 }
  0x49   : > { %p4116_p2 = pnand %p4115_p12, %p4111_p10 }
  0x4b   : > { %4119 = shalt.err (!%p4116_p2)
}
  0x4c   : > { %3844 = dma.hbm_to_vmem [thread:$0]  (!%p4403_p8), %s340_s24, 128, %s342_s22, %s330_s14  }
  0x4d   : > { %s375_s25 = scalar_lea.hbm %s6006_s2, %s4401_s18  ;;  %s371_s23 = scalar_lea.vmem [#allocation7], %s4398_s15 }
  0x4e   : > { %s377_s26 = sshll.u32 %s375_s25, 4  ;;  %s379_s20 = sshll.u32 %s371_s23, 4  ;;  %s378_s26 = int_to_ptr.hbm [resolvable:$true] %s377_s26  ;;  %s380_s20 = int_to_ptr.vmem [resolvable:$true] %s379_s20 }
  0x4f   : > { %s4135_s13 = sshra.s32 %s378_s26, 4  ;;  %s4142_s24 = scalar_lea.hbm %s6006_s2, 16  ;;  %s4136_s13 = int_to_ptr.hbm [resolvable:$true] %s4135_s13 }
  0x50   : > { %s4137_s21 = scalar_lea.hbm %s4136_s13, 8  ;;  %p4143_p10 = scmp.lt.s32.totalorder %s4136_s13, %s6006_s2 }
  0x51   : > { %p4138_p4 = scmp.ne.s32.totalorder %s4136_s13, %s4137_s21  ;;  %p4144_p6 = scmp.lt.s32.totalorder %s4142_s24, %s4137_s21 }
  0x53   : > { %p4140_p1 = pnand %p4138_p4, %p4019_p9  ;;  %p4145_p11 = por %p4144_p6, %p4143_p10 }
  0x55   : > { %p4141_p7 = pneg %p4140_p1 }
  0x57   : > { %p4146_p12 = pnand %p4145_p11, %p4141_p7 }
  0x59   : > { %4149 = shalt.err (!%p4146_p12)
}
  0x5a   : > { %3850 = dma.hbm_to_vmem [thread:$0]  (!%p4403_p8), %s378_s26, 128, %s380_s20, %s4416_s30  }
  0x5b   : > { %388 = sbr.rel (%p4346_p3) target bundleno = 1379 (0x563), region = 56  ;;  %s4483_s15 = sand.u32 (!%p4346_p3), 1, %s4235_s10  }
  0x5c   : > { %s4486_s18 = sshll.u32 (!%p4346_p3), %s4483_s15, 3  ;;  %s391_s8 = scalar_lea.sflag (!%p4346_p3), [#allocation3], %s4483_s15 }
  0x5d   : > { %s394_s12 = scalar_lea.vmem (!%p4346_p3), [#allocation2], %s4486_s18 }
  0x60   : > { %4210 = dma.done.wait (%p4382_p13), %s391_s8, 128  }
  0x61   : > { %4212 = vsyncadd (%p4382_p13), %s391_s8, 4294967168  ;;  %s400_s30 = sand.u32 1, %s4341_s16   ;;  %s404_s19 = scalar_lea.vmem [#allocation5], %s4486_s18 }
  0x62   : > { %s401_s17 = scalar_lea.sflag [#allocation6], %s400_s30 }
  0x63   : > { %4214 = dma.done.wait (%p4382_p13), %s401_s17, 256  }
  0x64   : > { %4216 = vsyncadd (%p4382_p13), %s401_s17, 4294967040  ;;  %s414_s1 = scalar_lea.vmem [#allocation7], %s4486_s18  ;;  %p6047_p3 = scmp.eq.s32.totalorder %s4341_s16, 0 }
  0x66   : > { %4218 = dma.done.wait (%p6047_p3), [#allocation9], 4096   ;;  %p6048_p8 = pmov %p6047_p3 }
  0x67   : > { %p6049_p9 = pmov %p6047_p3 }
  0x68   : > { %4220 = vsyncadd (%p6048_p8), [#allocation9], 4294963200 }
  0x69   : > { %4222 = dma.done.wait (%p6049_p9), [#allocation12], 2048   ;;  %p6050_p2 = pmov %p6047_p3 }
  0x6a   : > { %v493_v0 = vld [vmem:[#allocation8 + $0x78] sm:$0xff]  ;;  %v492_v1 = vld [vmem:[#allocation8 + $0x70] sm:$0xff]  ;;  %v491_v2 = vld [vmem:[#allocation8 + $0x68] sm:$0xff]  ;;  %s4250_s25 = smov 88   ;;  %s4251_s26 = smov 96   ;;  %vm606_vm0 = vcmask 1047556  }
  0x6b   : > { %4224 = vsyncadd (%p6050_p2), [#allocation12], 4294965248  ;;  %498 = vmatpush.msra.mxu0 %v493_v0  ;;  %v533_v3 = vld [vmem:[#allocation10 + $0x78] sm:$0xff]  ;;  %v532_v4 = vld [vmem:[#allocation10 + $0x70] sm:$0xff]  ;;  %s4252_s23 = smov 120   ;;  %s4253_s21 = smov 80  }
  0x6c   : > { %538 = vmatpush.msra.mxu1 %v533_v3  ;;  %v490_v5 = vld [vmem:[#allocation8 + $0x60] sm:$0xff]  ;;  %v531_v6 = vld [vmem:[#allocation10 + $0x68] sm:$0xff]  ;;  %v489_v7 = vld [vmem:[#allocation8 + $0x58] sm:$0xff]  ;;  %s4254_s3 = smov 104   ;;  %s4255_s27 = smov 112   ;;  %vm2042_vm1 = vcmask 64512  }
  0x6d   : > { %499 = vmatpush.msra.mxu0 %v492_v1  ;;  %v530_v8 = vld [vmem:[#allocation10 + $0x60] sm:$0xff]  ;;  %v488_v9 = vld [vmem:[#allocation8 + $0x50] sm:$0xff]  ;;  %v529_v10 = vld [vmem:[#allocation10 + $0x58] sm:$0xff]  ;;  %s4256_s24 = smov 64   ;;  %s4257_s22 = smov 72   ;;  %vm3512_vm2 = vcmask 130048  }
  0x6e   : > { %539 = vmatpush.msra.mxu1 %v532_v4  ;;  %v487_v11 = vld [vmem:[#allocation8 + $0x48] sm:$0xff]  ;;  %v528_v12 = vld [vmem:[#allocation10 + $0x50] sm:$0xff]  ;;  %v486_v13 = vld [vmem:[#allocation8 + $0x40] sm:$0xff]  ;;  %s4258_s14 = smov 32   ;;  %s4259_s8 = smov 48   ;;  %vm3514_vm3 = vcmask 195584  }
  0x6f   : > { %500 = vmatpush.msra.mxu0 %v491_v2  ;;  %v527_v14 = vld [vmem:[#allocation10 + $0x48] sm:$0xff]  ;;  %v485_v15 = vld [vmem:[#allocation8 + $0x38] sm:$0xff]  ;;  %v526_v16 = vld [vmem:[#allocation10 + $0x40] sm:$0xff]  ;;  %s4261_s30 = smov 24   ;;  %s4262_s17 = smov 40   ;;  %vm3516_vm4 = vcmask 261120  }
  0x70   : > { %540 = vmatpush.msra.mxu1 %v531_v6  ;;  %v484_v17 = vld [vmem:[#allocation8 + $0x30] sm:$0xff]  ;;  %v525_v18 = vld [vmem:[#allocation10 + $0x38] sm:$0xff]  ;;  %v483_v19 = vld [vmem:[#allocation8 + $0x28] sm:$0xff]  ;;  %s4264_s28 = smov 8   ;;  %v4265_v47 = vmov 1983009808  }
  0x71   : > { %501 = vmatpush.msra.mxu0 %v490_v5  ;;  %v524_v20 = vld [vmem:[#allocation10 + $0x30] sm:$0xff]  ;;  %v482_v21 = vld [vmem:[#allocation8 + $0x20] sm:$0xff]  ;;  %v523_v22 = vld [vmem:[#allocation10 + $0x28] sm:$0xff]  ;;  %v611_v48 = vunpack.c.l.s4 %v4265_v47  ;;  %v4266_v54 = vmov 1934713408   ;;  %vm3518_vm5 = vcmask 326656  }
  0x72   : > { %541 = vmatpush.msra.mxu1 %v530_v8  ;;  %v481_v23 = vld [vmem:[#allocation8 + $0x18] sm:$0xff]  ;;  %v522_v24 = vld [vmem:[#allocation10 + $0x20] sm:$0xff]  ;;  %v480_v25 = vld [vmem:[#allocation8 + $0x10] sm:$0xff]  ;;  %v659_v55 = vunpack.c.l.s4 %v4266_v54  ;;  %vm3520_vm6 = vcmask 392192   ;;  %vm3522_vm7 = vcmask 457728   ;;  %vm3524_vm8 = vcmask 523264  }
  0x73   : > { %502 = vmatpush.msra.mxu0 %v489_v7  ;;  %v521_v26 = vld [vmem:[#allocation10 + $0x18] sm:$0xff]  ;;  %v479_v27 = vld [vmem:[#allocation8 + $0x8] sm:$0xff]  ;;  %v520_v28 = vld [vmem:[#allocation10 + $0x10] sm:$0xff]  ;;  %v4589_v51 = vunpack.c.0.s8 %v611_v48  ;;  %vm3526_vm9 = vcmask 588800   ;;  %vm3528_vm10 = vcmask 654336   ;;  %vm3530_vm11 = vcmask 719872  }
  0x74   : > { %542 = vmatpush.msra.mxu1 %v529_v10  ;;  %v478_v29 = vld [vmem:[#allocation8] sm:$0xff]  ;;  %v519_v30 = vld [vmem:[#allocation10 + $0x8] sm:$0xff]  ;;  %v475_v31 = vld [vmem:[%s394_s12] sm:$0xff]  ;;  %s4260_s12 = smov 56   ;;  %v4601_v5 = vunpack.c.0.s8 %v659_v55  ;;  %vm3532_vm12 = vcmask 785408   ;;  %vm3534_vm13 = vcmask 850944  }
  0x75   : > { %503 = vmatpush.msra.mxu0 %v488_v9  ;;  %v518_v32 = vld [vmem:[#allocation10] sm:$0xff]  ;;  %v3917_v34 = vld [vmem:[%s6008_s4] ss:$0 sm:$0xff]  ;;  %vm3536_vm14 = vcmask 916480   ;;  %vm3538_vm15 = vcmask 982016  }
  0x76   : > { %543 = vmatpush.msra.mxu1 %v528_v12  ;;  %v476_v33 = vld [vmem:[%s404_s19] sm:$0xff]  ;;  %v3918_v37 = vld [vmem:[%s6010_s6] ss:$0 sm:$0xff]  ;;  %s4263_s19 = smov 16  }
  0x77   : > { %504 = vmatpush.msra.mxu0 %v487_v11 }
  0x78   : > { %544 = vmatpush.msra.mxu1 %v527_v14 }
  0x79   : > { %505 = vmatpush.msra.mxu0 %v486_v13 }
  0x7a   : > { %545 = vmatpush.msra.mxu1 %v526_v16 }
  0x7b   : > { %506 = vmatpush.msra.mxu0 %v485_v15 }
  0x7c   : > { %546 = vmatpush.msra.mxu1 %v525_v18 }
  0x7d   : > { %507 = vmatpush.msra.mxu0 %v484_v17 }
  0x7e   : > { %547 = vmatpush.msra.mxu1 %v524_v20 }
  0x7f   : > { %508 = vmatpush.msra.mxu0 %v483_v19 }
  0x80   : > { %548 = vmatpush.msra.mxu1 %v523_v22 }
  0x81   : > { %509 = vmatpush.msra.mxu0 %v482_v21 }
  0x82   : > { %549 = vmatpush.msra.mxu1 %v522_v24 }
  0x83   : > { %510 = vmatpush.msra.mxu0 %v481_v23 }
  0x84   : > { %550 = vmatpush.msra.mxu1 %v521_v26 }
  0x85   : > { %511 = vmatpush.msra.mxu0 %v480_v25 }
  0x86   : > { %551 = vmatpush.msra.mxu1 %v520_v28 }
  0x87   : > { %512 = vmatpush.msra.mxu0 %v479_v27 }
  0x88   : > { %552 = vmatpush.msra.mxu1 %v519_v30 }
  0x89   : > { %513 = vmatpush.msra.mxu0 %v478_v29 }
  0x8a   : > { %514 = vmatmul.f32.vlgmr.msra.gmra.mxu0 %v475_v31  ;;  %553 = vmatpush.msra.mxu1 %v518_v32 }
  0x8b   : > { %554 = vmatmul.f32.vlgmr.msra.gmra.mxu1 %v476_v33 }
 0x107   : > { %v515_v35 = vpop.f32.mrf.mxu0 }
 0x108   : > { %v4516_v36 = vadd.f32 %v3917_v34, %v515_v35  ;;  %v555_v38 = vpop.f32.mrf.mxu1 }
 0x109   : > { %v556_v39 = vadd.f32 %v3918_v37, %v555_v38 }
 0x10a   : > { %1067 = vrot.lane.b32.xlu2 %v4516_v36, %s4250_s25  ;;  %1064 = vrot.lane.b32.xlu1 %v4516_v36, %s4251_s26  ;;  %v1102_v56 = vrot.slane %v4516_v36, 4 }
 0x10b   : > { %1055 = vrot.lane.b32.xlu0 %v4516_v36, %s4252_s23  ;;  %v4533_v40 = vmul.f32 0.35355338, %v556_v39 }
 0x10d   : > { %v608_v15 = vrot.slane %v4533_v40, 4 }
 0x112   : > { %1070 = vrot.lane.b32.xlu2 %v4516_v36, %s4253_s21  ;;  %1061 = vrot.lane.b32.xlu1 %v4516_v36, %s4254_s3 }
 0x113   : > { %1058 = vrot.lane.b32.xlu0 %v4516_v36, %s4255_s27 }
 0x11a   : > { %1076 = vrot.lane.b32.xlu2 %v4516_v36, %s4256_s24  ;;  %563 = vrot.lane.b32.xlu1 %v4533_v40, %s4255_s27 }
 0x11b   : > { %1073 = vrot.lane.b32.xlu0 %v4516_v36, %s4257_s22 }
 0x122   : > { %569 = vrot.lane.b32.xlu2 %v4533_v40, %s4251_s26  ;;  %566 = vrot.lane.b32.xlu1 %v4533_v40, %s4254_s3 }
 0x123   : > { %560 = vrot.lane.b32.xlu0 %v4533_v40, %s4252_s23 }
 0x12a   : > { %572 = vrot.lane.b32.xlu2 %v4533_v40, %s4250_s25  ;;  %578 = vrot.lane.b32.xlu1 %v4533_v40, %s4257_s22 }
 0x12b   : > { %575 = vrot.lane.b32.xlu0 %v4533_v40, %s4253_s21 }
 0x132   : > { %1088 = vrot.lane.b32.xlu2 %v4516_v36, %s4258_s14  ;;  %1082 = vrot.lane.b32.xlu1 %v4516_v36, %s4259_s8 }
 0x133   : > { %1079 = vrot.lane.b32.xlu0 %v4516_v36, %s4260_s12 }
 0x13a   : > { %1091 = vrot.lane.b32.xlu2 %v4516_v36, %s4261_s30  ;;  %1085 = vrot.lane.b32.xlu1 %v4516_v36, %s4262_s17 }
 0x13b   : > { %1094 = vrot.lane.b32.xlu0 %v4516_v36, %s4263_s19 }
 0x142   : > { %587 = vrot.lane.b32.xlu2 %v4533_v40, %s4259_s8  ;;  %1097 = vrot.lane.b32.xlu1 %v4516_v36, %s4264_s28 }
 0x143   : > { %581 = vrot.lane.b32.xlu0 %v4533_v40, %s4256_s24 }
 0x14a   : > { %590 = vrot.lane.b32.xlu2 %v4533_v40, %s4262_s17  ;;  %584 = vrot.lane.b32.xlu1 %v4533_v40, %s4260_s12 }
 0x14b   : > { %593 = vrot.lane.b32.xlu0 %v4533_v40, %s4258_s14 }
 0x152   : > { %602 = vrot.lane.b32.xlu2 %v4533_v40, %s4264_s28  ;;  %599 = vrot.lane.b32.xlu1 %v4533_v40, %s4263_s19 }
 0x153   : > { %596 = vrot.lane.b32.xlu0 %v4533_v40, %s4261_s30 }
 0x164   : > { %v4583_v41 = vpop.permute.xlu2 %1067 }
 0x165   : > { %v1138_v16 = vrot.slane %v4583_v41, 4 }
 0x16c   : > { %v1071_v42 = vpop.permute.xlu2 %1070 }
 0x16d   : > { %v1124_v50 = vrot.slane %v1071_v42, 4 }
 0x174   : > { %v4585_v43 = vpop.permute.xlu2 %1076 }
 0x175   : > { %v1214_v17 = vrot.slane %v4585_v43, 4 }
 0x17c   : > { %v4587_v44 = vpop.permute.xlu2 %569  ;;  %v1065_v45 = vpop.permute.xlu1 %1064 }
 0x17d   : > { %v1056_v46 = vpop.permute.xlu0 %1055  ;;  %v1126_v57 = vrot.slane %v1065_v45, 4  ;;  %v1125_v61 = vsel %vm606_vm0, %v1124_v50, %v1065_v45  ;;  %v632_v22 = vrot.slane %v4587_v44, 4 }
 0x17e   : > { %v1114_v49 = vrot.slane %v1056_v46, 4  ;;  %v1131_v8 = vperm.slane %v1125_v61, %v4589_v51 }
 0x17f   : > { %v1127_v7 = vsel %vm606_vm0, %v1071_v42, %v1126_v57 }
 0x180   : > { %v1135_v18 = vperm.slane %v1127_v7, %v4589_v51  ;;  %v1174_v23 = vrot.slane %v1131_v8, 4 }
 0x182   : > { %v1186_v35 = vrot.slane %v1135_v18, 4 }
 0x184   : > { %v4591_v52 = vpop.permute.xlu2 %572  ;;  %v1062_v53 = vpop.permute.xlu1 %1061 }
 0x185   : > { %v1112_v58 = vrot.slane %v1062_v53, 4  ;;  %v1115_v59 = vsel %vm606_vm0, %v1062_v53, %v1114_v49  ;;  %v1059_v60 = vpop.permute.xlu0 %1058 }
 0x186   : > { %v1123_v62 = vperm.slane %v1115_v59, %v4589_v51  ;;  %v1100_v63 = vrot.slane %v1059_v60, 4  ;;  %v1103_v0 = vsel %vm606_vm0, %v1059_v60, %v1102_v56 }
 0x187   : > { %v1113_v1 = vsel %vm606_vm0, %v1112_v58, %v1056_v46  ;;  %v1111_v2 = vperm.slane %v1103_v0, %v4589_v51 }
 0x188   : > { %v1119_v3 = vperm.slane %v1113_v1, %v4589_v51  ;;  %v1160_v4 = vrot.slane %v1123_v62, 4  ;;  %v1101_v6 = vsel %vm606_vm0, %v1100_v63, %v4516_v36  ;;  %v644_v36 = vrot.slane %v4591_v52, 4 }
 0x189   : > { %v1107_v9 = vperm.slane %v1101_v6, %v4589_v51  ;;  %v1162_v10 = vrot.slane %v1111_v2, 4 }
 0x18a   : > { %v1148_v11 = vrot.slane %v1119_v3, 4  ;;  %v1161_v12 = vsel %vm606_vm0, %v1160_v4, %v1111_v2 }
 0x18b   : > { %v1150_v13 = vrot.slane %v1107_v9, 4  ;;  %v1163_v14 = vsel %vm606_vm0, %v1123_v62, %v1162_v10  ;;  %v1167_v25 = vperm.slane %v1161_v12, %v4601_v5 }
 0x18c   : > { %v1149_v19 = vsel %vm606_vm0, %v1148_v11, %v1107_v9  ;;  %v4615_v20 = vpop.permute.xlu2 %1088  ;;  %v564_v21 = vpop.permute.xlu1 %563  ;;  %v1171_v28 = vperm.slane %v1163_v14, %v4601_v5 }
 0x18d   : > { %v1151_v24 = vsel %vm606_vm0, %v1119_v3, %v1150_v13  ;;  %v1074_v26 = vpop.permute.xlu0 %1073  ;;  %v4621_v27 = vperm.slane %v1149_v19, %v4601_v5  ;;  %v605_v29 = vrot.slane %v564_v21, 4  ;;  %v609_v30 = vsel %vm606_vm0, %v564_v21, %v608_v15 }
 0x18e   : > { %v1159_v31 = vperm.slane %v1151_v24, %v4601_v5  ;;  %v4627_v32 = vperm.slane %v609_v30, %v4589_v51  ;;  %v1136_v33 = vrot.slane %v1074_v26, 4  ;;  %v1139_v34 = vsel %vm606_vm0, %v1074_v26, %v1138_v16 }
 0x18f   : > { %v607_v37 = vsel %vm606_vm0, %v605_v29, %v4533_v40  ;;  %v1147_v38 = vperm.slane %v1139_v34, %v4589_v51  ;;  %v1206_v39 = vrot.slane %v1167_v25, 4  ;;  %v1238_v42 = vrot.slane %v4615_v20, 4 }
 0x190   : > { %v613_v45 = vperm.slane %v607_v37, %v4589_v51  ;;  %v1137_v46 = vsel %vm606_vm0, %v1136_v33, %v4583_v41  ;;  %v1210_v47 = vrot.slane %v1171_v28, 4  ;;  %v1198_v53 = vrot.slane %v4621_v27, 4 }
 0x191   : > { %v1143_v48 = vperm.slane %v1137_v46, %v4589_v51  ;;  %v1184_v49 = vrot.slane %v1147_v38, 4  ;;  %v1187_v50 = vsel %vm606_vm0, %v1147_v38, %v1186_v35  ;;  %v1202_v54 = vrot.slane %v1159_v31, 4 }
 0x192   : > { %v668_v40 = vrot.slane %v4627_v32, 4  ;;  %v1195_v55 = vperm.slane %v1187_v50, %v4601_v5  ;;  %v656_v56 = vrot.slane %v613_v45, 4 }
 0x193   : > { %v1172_v57 = vrot.slane %v1143_v48, 4  ;;  %v1175_v58 = vsel %vm606_vm0, %v1143_v48, %v1174_v23  ;;  %v1185_v59 = vsel %vm606_vm0, %v1184_v49, %v1135_v18 }
 0x194   : > { %v4645_v41 = vpop.permute.xlu2 %1091  ;;  %v567_v60 = vpop.permute.xlu1 %566  ;;  %v1183_v61 = vperm.slane %v1175_v58, %v4601_v5  ;;  %v1191_v62 = vperm.slane %v1185_v59, %v4601_v5  ;;  %v1208_v63 = vrot.slane %v1195_v55, 4  ;;  %v4650_v0 = vsel %vm606_vm0, %v1195_v55, %v1210_v47 }
 0x195   : > { %v561_v1 = vpop.permute.xlu0 %560  ;;  %v1173_v2 = vsel %vm606_vm0, %v1172_v57, %v1131_v8  ;;  %v1360_v3 = vrot.slane %v4650_v0, 4  ;;  %v1250_v4 = vrot.slane %v4645_v41, 4  ;;  %v618_v6 = vrot.slane %v567_v60, 4 }
 0x196   : > { %v1179_v7 = vperm.slane %v1173_v2, %v4601_v5  ;;  %v1200_v9 = vrot.slane %v1183_v61, 4  ;;  %v4657_v10 = vsel %vm606_vm0, %v1183_v61, %v1202_v54  ;;  %v1204_v11 = vrot.slane %v1191_v62, 4 }
 0x197   : > { %v4660_v12 = vsel %vm606_vm0, %v1191_v62, %v1206_v39  ;;  %v4663_v13 = vsel %vm606_vm0, %v1208_v63, %v1171_v28  ;;  %v619_v8 = vsel %vm606_vm0, %v618_v6, %v561_v1  ;;  %v620_v14 = vrot.slane %v561_v1, 4 }
 0x198   : > { %v1196_v15 = vrot.slane %v1179_v7, 4  ;;  %v1348_v16 = vrot.slane %v4663_v13, 4  ;;  %v1362_v18 = vrot.slane %v4660_v12, 4  ;;  %v625_v19 = vperm.slane %v619_v8, %v4589_v51 }
 0x199   : > { %v621_v21 = vsel %vm606_vm0, %v567_v60, %v620_v14  ;;  %v4671_v23 = vsel %vm606_vm0, %v1179_v7, %v1198_v53  ;;  %v4674_v24 = vsel %vm606_vm0, %v1200_v9, %v1159_v31  ;;  %v4677_v26 = vsel %vm606_vm0, %v1204_v11, %v1167_v25 }
 0x19a   : > { %v4681_v28 = vsel %vm606_vm0, %v4650_v0, %v1362_v18  ;;  %v629_v29 = vperm.slane %v621_v21, %v4589_v51  ;;  %v654_v30 = vrot.slane %v625_v19, 4  ;;  %v657_v33 = vsel %vm606_vm0, %v625_v19, %v656_v56 }
 0x19b   : > { %v4686_v34 = vperm.slane %v657_v33, %v4601_v5  ;;  %v4692_v31 = vsel %vm606_vm0, %v1196_v15, %v4621_v27  ;;  %v1324_v25 = vrot.slane %v4674_v24, 4  ;;  %v1336_v38 = vrot.slane %v4657_v10, 4 }
 0x19c   : > { %v4688_v35 = vpop.permute.xlu2 %587  ;;  %v579_v37 = vpop.permute.xlu1 %578  ;;  %v655_v39 = vsel %vm606_vm0, %v654_v30, %v613_v45  ;;  %v666_v46 = vrot.slane %v629_v29, 4  ;;  %v669_v47 = vsel %vm606_vm0, %v629_v29, %v668_v40  ;;  %v1326_v2 = vrot.slane %v4692_v31, 4 }
 0x19d   : > { %v718_v48 = vrot.slane %v4688_v35, 4  ;;  %v576_v49 = vpop.permute.xlu0 %575  ;;  %v4700_v50 = vperm.slane %v655_v39, %v4601_v5  ;;  %v677_v53 = vperm.slane %v669_v47, %v4601_v5  ;;  %v708_v27 = vrot.slane %v4686_v34, 4 }
 0x19e   : > { %v642_v54 = vrot.slane %v579_v37, 4  ;;  %v667_v55 = vsel %vm606_vm0, %v666_v46, %v4627_v32  ;;  %v645_v45 = vsel %vm606_vm0, %v579_v37, %v644_v36  ;;  %v630_v56 = vrot.slane %v576_v49, 4 }
 0x19f   : > { %v633_v40 = vsel %vm606_vm0, %v576_v49, %v632_v22  ;;  %v673_v57 = vperm.slane %v667_v55, %v4601_v5  ;;  %v704_v58 = vrot.slane %v4700_v50, 4  ;;  %v716_v59 = vrot.slane %v677_v53, 4 }
 0x1a0   : > { %v643_v60 = vsel %vm606_vm0, %v642_v54, %v4591_v52  ;;  %v653_v32 = vperm.slane %v645_v45, %v4589_v51  ;;  %v631_v36 = vsel %vm606_vm0, %v630_v56, %v4587_v44  ;;  %v641_v62 = vperm.slane %v633_v40, %v4589_v51 }
 0x1a1   : > { %v649_v61 = vperm.slane %v643_v60, %v4589_v51  ;;  %v712_v63 = vrot.slane %v673_v57, 4  ;;  %v637_v22 = vperm.slane %v631_v36, %v4589_v51  ;;  %v1325_v1 = vsel %vm606_vm0, %v1324_v25, %v4692_v31 }
 0x1a2   : > { %v690_v7 = vrot.slane %v653_v32, 4  ;;  %v692_v52 = vrot.slane %v641_v62, 4  ;;  %v1331_v9 = vperm.slane %v1325_v1, %v4589_v51  ;;  %v1337_v8 = vsel %vm606_vm0, %v1336_v38, %v4671_v23 }
 0x1a3   : > { %v678_v6 = vrot.slane %v649_v61, 4  ;;  %v680_v11 = vrot.slane %v637_v22, 4  ;;  %v1338_v44 = vrot.slane %v4671_v23, 4  ;;  %v1349_v14 = vsel %vm606_vm0, %v1348_v16, %v4677_v26 }
 0x1a4   : > { %v691_v18 = vsel %vm606_vm0, %v690_v7, %v641_v62  ;;  %v693_v19 = vsel %vm606_vm0, %v653_v32, %v692_v52  ;;  %v1343_v21 = vperm.slane %v1337_v8, %v4589_v51  ;;  %v1350_v16 = vrot.slane %v4677_v26, 4  ;;  %v4758_v45 = vpop.permute.xlu2 %590  ;;  %v1083_v0 = vpop.permute.xlu1 %1082 }
 0x1a5   : > { %v679_v15 = vsel %vm606_vm0, %v678_v6, %v637_v22  ;;  %v681_v29 = vsel %vm606_vm0, %v649_v61, %v680_v11  ;;  %v697_v33 = vperm.slane %v691_v18, %v4601_v5  ;;  %v701_v23 = vperm.slane %v693_v19, %v4601_v5  ;;  %v1080_v6 = vpop.permute.xlu0 %1079 }
 0x1a6   : > { %v4737_v30 = vperm.slane %v679_v15, %v4601_v5  ;;  %v4742_v37 = vperm.slane %v681_v29, %v4601_v5  ;;  %v1355_v31 = vperm.slane %v1349_v14, %v4589_v51  ;;  %v1361_v25 = vsel %vm606_vm0, %v1360_v3, %v4660_v12 }
 0x1a7   : > { %v710_v39 = vrot.slane %v697_v33, 4  ;;  %v713_v46 = vsel %vm606_vm0, %v697_v33, %v712_v63  ;;  %v714_v47 = vrot.slane %v701_v23, 4  ;;  %v717_v26 = vsel %vm606_vm0, %v701_v23, %v716_v59 }
 0x1a8   : > { %v702_v38 = vrot.slane %v4737_v30, 4  ;;  %v706_v49 = vrot.slane %v4742_v37, 4  ;;  %v4755_v54 = vsel %vm606_vm0, %v4742_v37, %v708_v27  ;;  %v868_v55 = vrot.slane %v713_v46, 4 }
 0x1a9   : > { %v4761_v3 = vsel %vm606_vm0, %v710_v39, %v673_v57  ;;  %v4764_v12 = vsel %vm606_vm0, %v714_v47, %v677_v53  ;;  %v866_v56 = vrot.slane %v717_v26, 4  ;;  %v1367_v40 = vperm.slane %v1361_v25, %v4589_v51 }
 0x1aa   : > { %v854_v60 = vrot.slane %v4764_v12, 4  ;;  %v856_v27 = vrot.slane %v4761_v3, 4  ;;  %v4770_v59 = vsel %vm606_vm0, %v717_v26, %v868_v55  ;;  %v1372_v61 = vrot.slane %v1343_v21, 4 }
 0x1ab   : > { %v4773_v32 = vsel %vm606_vm0, %v866_v56, %v713_v46  ;;  %v1396_v36 = vrot.slane %v1367_v40, 4  ;;  %v1374_v57 = vrot.slane %v1331_v9, 4  ;;  %v1398_v62 = vrot.slane %v1355_v31, 4 }
 0x1ac   : > { %v1373_v53 = vsel %vm606_vm0, %v1372_v61, %v1331_v9  ;;  %v1327_v63 = vsel %vm606_vm0, %v4674_v24, %v1326_v2  ;;  %v1339_v22 = vsel %vm606_vm0, %v4657_v10, %v1338_v44  ;;  %v1351_v1 = vsel %vm606_vm0, %v4663_v13, %v1350_v16  ;;  %v4808_v47 = vpop.permute.xlu2 %602  ;;  %v1086_v26 = vpop.permute.xlu1 %1085 }
 0x1ad   : > { %v1379_v7 = vperm.slane %v1373_v53, %v4601_v5  ;;  %v1397_v52 = vsel %vm606_vm0, %v1396_v36, %v1355_v31  ;;  %v1375_v11 = vsel %vm606_vm0, %v1343_v21, %v1374_v57  ;;  %v1399_v8 = vsel %vm606_vm0, %v1367_v40, %v1398_v62 }
 0x1ae   : > { %v1403_v9 = vperm.slane %v1397_v52, %v4601_v5  ;;  %v4788_v14 = vperm.slane %v1375_v11, %v4601_v5  ;;  %v4791_v24 = vperm.slane %v1399_v8, %v4601_v5  ;;  %v1335_v10 = vperm.slane %v1327_v63, %v4589_v51  ;;  %v1095_v11 = vpop.permute.xlu0 %1094 }
 0x1af   : > { %v1422_v13 = vrot.slane %v1379_v7, 4  ;;  %v1347_v2 = vperm.slane %v1339_v22, %v4589_v51  ;;  %v1359_v44 = vperm.slane %v1351_v1, %v4589_v51  ;;  %v1371_v15 = vperm.slane %v4681_v28, %v4589_v51 }
 0x1b0   : > { %v1420_v18 = vrot.slane %v1403_v9, 4  ;;  %v1424_v19 = vrot.slane %v4791_v24, 4  ;;  %v1426_v21 = vrot.slane %v4788_v14, 4  ;;  %v730_v29 = vrot.slane %v4758_v45, 4 }
 0x1b1   : > { %v1423_v33 = vsel %vm606_vm0, %v1403_v9, %v1422_v13  ;;  %v1384_v23 = vrot.slane %v1347_v2, 4  ;;  %v1408_v16 = vrot.slane %v1371_v15, 4  ;;  %v1212_v31 = vrot.slane %v1083_v0, 4 }
 0x1b2   : > { %v1421_v25 = vsel %vm606_vm0, %v1420_v18, %v1379_v7  ;;  %v1425_v39 = vsel %vm606_vm0, %v1424_v19, %v4788_v14  ;;  %v1215_v28 = vsel %vm606_vm0, %v1083_v0, %v1214_v17  ;;  %v1226_v46 = vrot.slane %v1080_v6, 4 }
 0x1b3   : > { %3759 = vmatpush.xpose.msk.msra.mxu3 %vm2042_vm1, %v1421_v25  ;;  %3763 = vmatpush.xpose.msk.msrb.mxu0 %vm2042_vm1, %v1425_v39  ;;  %v1385_v55 = vsel %vm606_vm0, %v1384_v23, %v1335_v10  ;;  %v1409_v56 = vsel %vm606_vm0, %v1408_v16, %v1359_v44  ;;  %v1213_v40 = vsel %vm606_vm0, %v1212_v31, %v4585_v43  ;;  %v1386_v61 = vrot.slane %v1335_v10, 4 }
 0x1b4   : > { %v4818_v17 = vperm.slane %v1385_v55, %v4601_v5  ;;  %v4821_v0 = vperm.slane %v1409_v56, %v4601_v5  ;;  %v1219_v36 = vperm.slane %v1213_v40, %v4589_v51  ;;  %v1223_v57 = vperm.slane %v1215_v28, %v4589_v51 }
 0x1b5   : > { %v1387_v62 = vsel %vm606_vm0, %v1347_v2, %v1386_v61  ;;  %v1410_v53 = vrot.slane %v1359_v44, 4  ;;  %v754_v63 = vrot.slane %v4808_v47, 4  ;;  %v1224_v22 = vrot.slane %v1086_v26, 4 }
 0x1b6   : > { %v1428_v43 = vrot.slane %v4821_v0, 4  ;;  %v1430_v1 = vrot.slane %v4818_v17, 4  ;;  %v1262_v7 = vrot.slane %v1219_v36, 4  ;;  %v1274_v52 = vrot.slane %v1223_v57, 4 }
 0x1b7   : > { %3761 = vmatpush.xpose.msk.msrb.mxu3 %vm2042_vm1, %v1423_v33  ;;  %v4830_v8 = vperm.slane %v1387_v62, %v4601_v5  ;;  %v1411_v9 = vsel %vm606_vm0, %v1371_v15, %v1410_v53  ;;  %v1225_v10 = vsel %vm606_vm0, %v1224_v22, %v1080_v6  ;;  %v1227_v13 = vsel %vm606_vm0, %v1086_v26, %v1226_v46 }
 0x1b8   : > { %v1429_v2 = vsel %vm606_vm0, %v1428_v43, %v4818_v17  ;;  %v4838_v44 = vperm.slane %v1411_v9, %v4601_v5  ;;  %v1231_v18 = vperm.slane %v1225_v10, %v4589_v51  ;;  %v1235_v19 = vperm.slane %v1227_v13, %v4589_v51 }
 0x1b9   : > { %3767 = vmatpush.xpose.msk.msrb.mxu1 %vm2042_vm1, %v1429_v2  ;;  %v1434_v33 = vrot.slane %v4830_v8, 4  ;;  %v1236_v23 = vrot.slane %v1095_v11, 4  ;;  %v1239_v6 = vsel %vm606_vm0, %v1095_v11, %v1238_v42  ;;  %v703_v15 = vsel %vm606_vm0, %v702_v38, %v4700_v50 }
 0x1ba   : > { %v1432_v16 = vrot.slane %v4838_v44, 4  ;;  %v1260_v31 = vrot.slane %v1231_v18, 4  ;;  %v1263_v25 = vsel %vm606_vm0, %v1231_v18, %v1262_v7  ;;  %v1272_v39 = vrot.slane %v1235_v19, 4  ;;  %v1098_v18 = vpop.permute.xlu1 %1097 }
 0x1bb   : > { %v4854_v28 = vperm.slane %v1263_v25, %v4601_v5  ;;  %v1275_v46 = vsel %vm606_vm0, %v1235_v19, %v1274_v52  ;;  %v1237_v26 = vsel %vm606_vm0, %v1236_v23, %v4615_v20  ;;  %v4860_v42 = vperm.slane %v1239_v6, %v4589_v51 }
 0x1bc   : > { %v1433_v38 = vsel %vm606_vm0, %v1432_v16, %v4830_v8  ;;  %v1261_v55 = vsel %vm606_vm0, %v1260_v31, %v1219_v36  ;;  %v1273_v56 = vsel %vm606_vm0, %v1272_v39, %v1223_v57  ;;  %v4867_v40 = vperm.slane %v1275_v46, %v4601_v5 }
 0x1bd   : > { %3771 = vmatpush.xpose.msk.msra.mxu2 %vm2042_vm1, %v1433_v38  ;;  %v4871_v61 = vperm.slane %v1261_v55, %v4601_v5  ;;  %v4874_v20 = vperm.slane %v1273_v56, %v4601_v5  ;;  %v1314_v62 = vrot.slane %v4854_v28, 4  ;;  %v4878_v53 = vperm.slane %v1237_v26, %v4589_v51 }
 0x1be   : > { %v1322_v36 = vrot.slane %v4867_v40, 4  ;;  %v1298_v57 = vrot.slane %v4860_v42, 4  ;;  %v705_v22 = vsel %vm606_vm0, %v4737_v30, %v704_v58  ;;  %v707_v43 = vsel %vm606_vm0, %v706_v49, %v4686_v34  ;;  %v4900_v58 = vld [vmem:[%s414_s1] sm:$0xff] }
 0x1bf   : > { %v1310_v7 = vrot.slane %v4871_v61, 4  ;;  %v1318_v52 = vrot.slane %v4874_v20, 4  ;;  %v1286_v11 = vrot.slane %v4878_v53, 4  ;;  %v830_v9 = vrot.slane %v707_v43, 4  ;;  %1549 = vrot.lane.b32.xlu0 %v4900_v58, %s4252_s23  ;;  %1552 = vrot.lane.b32.xlu1 %v4900_v58, %s4255_s27 }
 0x1c0   : > { %v832_v10 = vrot.slane %v703_v15, 4  ;;  %v842_v13 = vrot.slane %v4755_v54, 4  ;;  %v844_v2 = vrot.slane %v705_v22, 4  ;;  %v855_v50 = vsel %vm606_vm0, %v854_v60, %v4761_v3  ;;  %1558 = vrot.lane.b32.xlu2 %v4900_v58, %s4251_s26 }
 0x1c1   : > { %v831_v34 = vsel %vm606_vm0, %v830_v9, %v703_v15  ;;  %v4904_v30 = vperm.slane %v855_v50, %v4589_v51  ;;  %v4908_v37 = vperm.slane %v4773_v32, %v4589_v51  ;;  %v1427_v49 = vsel %vm606_vm0, %v4791_v24, %v1426_v21  ;;  %v4935_v15 = vpop.permute.xlu0 %581 }
 0x1c2   : > { %v4917_v60 = vperm.slane %v831_v34, %v4589_v51  ;;  %v843_v19 = vsel %vm606_vm0, %v842_v13, %v705_v22  ;;  %v833_v23 = vsel %vm606_vm0, %v707_v43, %v832_v10  ;;  %v845_v32 = vsel %vm606_vm0, %v4755_v54, %v844_v2 }
 0x1c3   : > { %v4926_v14 = vperm.slane %v843_v19, %v4589_v51  ;;  %v902_v24 = vrot.slane %v4908_v37, 4  ;;  %v4930_v21 = vperm.slane %v833_v23, %v4589_v51  ;;  %v4933_v6 = vperm.slane %v845_v32, %v4589_v51 }
 0x1c4   : > { %v857_v54 = vsel %vm606_vm0, %v4764_v12, %v856_v27  ;;  %v4945_v16 = vperm.slane %v4770_v59, %v4589_v51  ;;  %v1248_v31 = vrot.slane %v1098_v18, 4  ;;  %v1251_v25 = vsel %vm606_vm0, %v1098_v18, %v1250_v4 }
 0x1c5   : > { %v878_v39 = vrot.slane %v4926_v14, 4  ;;  %v903_v46 = vsel %vm606_vm0, %v902_v24, %v4904_v30  ;;  %v4954_v26 = vperm.slane %v857_v54, %v4589_v51  ;;  %v890_v3 = vrot.slane %v4933_v6, 4 }
 0x1c6   : > { %v4958_v12 = vperm.slane %v903_v46, %v4601_v5  ;;  %v914_v27 = vrot.slane %v4945_v16, 4  ;;  %v1249_v59 = vsel %vm606_vm0, %v1248_v31, %v4645_v41  ;;  %v1259_v4 = vperm.slane %v1251_v25, %v4589_v51 }
 0x1c7   : > { %v879_v38 = vsel %vm606_vm0, %v878_v39, %v4917_v60  ;;  %v891_v55 = vsel %vm606_vm0, %v890_v3, %v4930_v21  ;;  %v1255_v56 = vperm.slane %v1249_v59, %v4589_v51  ;;  %v719_v22 = vsel %vm606_vm0, %v718_v48, %v4935_v15  ;;  %1555 = vrot.lane.b32.xlu0 %v4900_v58, %s4254_s3  ;;  %v585_v3 = vpop.permute.xlu1 %584 }
 0x1c8   : > { %v4974_v43 = vperm.slane %v879_v38, %v4601_v5  ;;  %v926_v41 = vrot.slane %v4958_v12, 4  ;;  %v4978_v9 = vperm.slane %v891_v55, %v4601_v5  ;;  %v915_v10 = vsel %vm606_vm0, %v914_v27, %v4954_v26  ;;  %1561 = vrot.lane.b32.xlu1 %v4900_v58, %s4250_s25  ;;  %1567 = vrot.lane.b32.xlu2 %v4900_v58, %s4257_s22 }
 0x1c9   : > { %v4983_v13 = vperm.slane %v915_v10, %v4601_v5  ;;  %v1284_v2 = vrot.slane %v1255_v56, 4  ;;  %v1287_v50 = vsel %vm606_vm0, %v1255_v56, %v1286_v11  ;;  %v1296_v34 = vrot.slane %v1259_v4, 4  ;;  %v5026_v27 = vpop.permute.xlu0 %593 }
 0x1ca   : > { %v927_v48 = vsel %vm606_vm0, %v926_v41, %v4974_v43  ;;  %v936_v18 = vrot.slane %v4978_v9, 4  ;;  %v4992_v19 = vperm.slane %v1287_v50, %v4601_v5  ;;  %v1299_v23 = vsel %vm606_vm0, %v1259_v4, %v1298_v57 }
 0x1cb   : > { %3760 = vmatmul.msk.f32.vlgmr.msra.gmra.mxu3 %vm2042_vm1, %v927_v48  ;;  %v934_v11 = vrot.slane %v4983_v13, 4  ;;  %v1285_v32 = vsel %vm606_vm0, %v1284_v2, %v4878_v53  ;;  %v1297_v24 = vsel %vm606_vm0, %v1296_v34, %v4860_v42  ;;  %v1307_v54 = vperm.slane %v1299_v23, %v4601_v5 }
 0x1cc   : > { %3765 = vmatpush.xpose.msk.msra.mxu3 %vm2042_vm1, %v1427_v49  ;;  %v5008_v57 = vperm.slane %v1285_v32, %v4601_v5  ;;  %v1303_v31 = vperm.slane %v1297_v24, %v4601_v5  ;;  %v1312_v25 = vrot.slane %v4992_v19, 4  ;;  %v5016_v53 = vsel %vm606_vm0, %v4992_v19, %v1314_v62 }
 0x1cd   : > { %v935_v42 = vsel %vm606_vm0, %v934_v11, %v4978_v9  ;;  %v1320_v39 = vrot.slane %v1307_v54, 4  ;;  %v5023_v49 = vsel %vm606_vm0, %v1307_v54, %v1322_v36  ;;  %v1448_v46 = vrot.slane %v5016_v53, 4 }
 0x1ce   : > { %3768 = vmatmul.msk.f32.vlgmr.msrb.gmra.mxu1 %vm2042_vm1, %v935_v42  ;;  %v1308_v59 = vrot.slane %v5008_v57, 4  ;;  %v1316_v62 = vrot.slane %v1303_v31, 4  ;;  %v5033_v4 = vsel %vm606_vm0, %v1303_v31, %v1318_v52  ;;  %v1472_v38 = vrot.slane %v5023_v49, 4 }
 0x1cf   : > { %v5038_v36 = vsel %vm606_vm0, %v1320_v39, %v4867_v40  ;;  %v1474_v55 = vrot.slane %v5033_v4, 4  ;;  %v720_v56 = vrot.slane %v4935_v15, 4  ;;  %v725_v41 = vperm.slane %v719_v22, %v4589_v51  ;;  %1564 = vrot.lane.b32.xlu0 %v4900_v58, %s4253_s21 }
 0x1d0   : > { %v5045_v10 = vsel %vm606_vm0, %v1316_v62, %v4874_v20  ;;  %v1460_v2 = vrot.slane %v5038_v36, 4  ;;  %v880_v52 = vrot.slane %v4917_v60, 4  ;;  %v904_v50 = vrot.slane %v4904_v30, 4  ;;  %1570 = vrot.lane.b32.xlu1 %v4900_v58, %s4256_s24  ;;  %1573 = vrot.lane.b32.xlu2 %v4900_v58, %s4260_s12 }
 0x1d1   : > { %v1462_v34 = vrot.slane %v5045_v10, 4  ;;  %v1475_v40 = vsel %vm606_vm0, %v5023_v49, %v1474_v55  ;;  %v721_v15 = vsel %vm606_vm0, %v4688_v35, %v720_v56  ;;  %v768_v48 = vrot.slane %v725_v41, 4  ;;  %v600_v55 = vpop.permute.xlu1 %599  ;;  %v597_v56 = vpop.permute.xlu0 %596 }
 0x1d2   : > { %v5058_v20 = vperm.slane %v1475_v40, %v4589_v51  ;;  %v729_v22 = vperm.slane %v721_v15, %v4589_v51  ;;  %v881_v30 = vsel %vm606_vm0, %v4926_v14, %v880_v52  ;;  %v905_v60 = vsel %vm606_vm0, %v4908_v37, %v904_v50 }
 0x1d3   : > { %v5069_v35 = vsel %vm606_vm0, %v5038_v36, %v1462_v34  ;;  %v889_v23 = vperm.slane %v881_v30, %v4601_v5  ;;  %v913_v11 = vperm.slane %v905_v60, %v4601_v5  ;;  %v892_v32 = vrot.slane %v4930_v21, 4 }
 0x1d4   : > { %v780_v14 = vrot.slane %v729_v22, 4  ;;  %v916_v24 = vrot.slane %v4954_v26, 4  ;;  %v928_v37 = vrot.slane %v4974_v43, 4  ;;  %v1431_v54 = vsel %vm606_vm0, %v4821_v0, %v1430_v1 }
 0x1d5   : > { %v930_v31 = vrot.slane %v913_v11, 4  ;;  %v932_v42 = vrot.slane %v889_v23, 4  ;;  %v893_v39 = vsel %vm606_vm0, %v4933_v6, %v892_v32  ;;  %v731_v21 = vsel %vm606_vm0, %v730_v29, %v585_v3 }
 0x1d6   : > { %v5088_v62 = vperm.slane %v893_v39, %v4601_v5  ;;  %v917_v26 = vsel %vm606_vm0, %v4945_v16, %v916_v24  ;;  %v929_v17 = vsel %vm606_vm0, %v4958_v12, %v928_v37  ;;  %v732_v43 = vrot.slane %v585_v3, 4 }
 0x1d7   : > { %v931_v0 = vsel %vm606_vm0, %v930_v31, %v889_v23  ;;  %v5096_v1 = vperm.slane %v917_v26, %v4601_v5  ;;  %3762 = vmatmul.msk.f32.vlgmr.msrb.gmra.mxu3 %vm2042_vm1, %v929_v17  ;;  %v737_v6 = vperm.slane %v731_v21, %v4589_v51  ;;  %v744_v29 = vrot.slane %v5026_v27, 4 }
 0x1d8   : > { %3764 = vmatmul.msk.f32.vlgmr.msrb.gmra.mxu0 %vm2042_vm1, %v931_v0  ;;  %v940_v16 = vrot.slane %v5088_v62, 4  ;;  %3769 = vmatpush.xpose.msk.msrb.mxu3 %vm2042_vm1, %v1431_v54  ;;  %v733_v12 = vsel %vm606_vm0, %v4758_v45, %v732_v43  ;;  %v933_v3 = vsel %vm606_vm0, %v913_v11, %v932_v42  ;;  %v1435_v52 = vsel %vm606_vm0, %v4838_v44, %v1434_v33 }
 0x1d9   : > { %v938_v50 = vrot.slane %v5096_v1, 4  ;;  %v741_v34 = vperm.slane %v733_v12, %v4589_v51  ;;  %v766_v40 = vrot.slane %v737_v6, 4  ;;  %v769_v15 = vsel %vm606_vm0, %v737_v6, %v768_v48  ;;  %1576 = vrot.lane.b32.xlu1 %v4900_v58, %s4259_s8  ;;  %1582 = vrot.lane.b32.xlu2 %v4900_v58, %s4258_s14 }
 0x1da   : > { %v777_v30 = vperm.slane %v769_v15, %v4601_v5  ;;  %v742_v60 = vrot.slane %v600_v55, 4  ;;  %v745_v23 = vsel %vm606_vm0, %v600_v55, %v744_v29  ;;  %v755_v45 = vsel %vm606_vm0, %v754_v63, %v597_v56 }
 0x1db   : > { %v939_v8 = vsel %vm606_vm0, %v938_v50, %v5088_v62  ;;  %v767_v44 = vsel %vm606_vm0, %v766_v40, %v725_v41  ;;  %v778_v33 = vrot.slane %v741_v34, 4  ;;  %v781_v48 = vsel %vm606_vm0, %v741_v34, %v780_v14 }
 0x1dc   : > { %3772 = vmatmul.msk.f32.vlgmr.msra.gmra.mxu2 %vm2042_vm1, %v939_v8  ;;  %v5129_v11 = vperm.slane %v767_v44, %v4601_v5  ;;  %v789_v63 = vperm.slane %v781_v48, %v4601_v5  ;;  %v820_v32 = vrot.slane %v777_v30, 4  ;;  %v743_v24 = vsel %vm606_vm0, %v742_v60, %v5026_v27 }
 0x1dd   : > { %v779_v37 = vsel %vm606_vm0, %v778_v33, %v729_v22  ;;  %v749_v41 = vperm.slane %v743_v24, %v4589_v51  ;;  %v753_v14 = vperm.slane %v745_v23, %v4589_v51  ;;  %v756_v54 = vrot.slane %v597_v56, 4 }
 0x1de   : > { %v5138_v31 = vperm.slane %v779_v37, %v4601_v5  ;;  %v816_v42 = vrot.slane %v5129_v11, 4  ;;  %v828_v39 = vrot.slane %v789_v63, 4  ;;  %v761_v21 = vperm.slane %v755_v45, %v4589_v51 }
 0x1df   : > { %3766 = vmatmul.msk.f32.vlgmr.msra.gmra.mxu3 %vm2042_vm1, %v933_v3  ;;  %v792_v26 = vrot.slane %v749_v41, 4  ;;  %v804_v17 = vrot.slane %v753_v14, 4  ;;  %v757_v27 = vsel %vm606_vm0, %v4808_v47, %v756_v54  ;;  %v1309_v22 = vsel %vm606_vm0, %v1308_v59, %v4871_v61 }
 0x1e0   : > { %v824_v43 = vrot.slane %v5138_v31, 4  ;;  %3773 = vmatpush.xpose.msk.msra.mxu3 %vm2042_vm1, %v1435_v52  ;;  %v765_v0 = vperm.slane %v757_v27, %v4589_v51  ;;  %v790_v6 = vrot.slane %v761_v21, 4  ;;  %v1311_v29 = vsel %vm606_vm0, %v5008_v57, %v1310_v7 }
 0x1e1   : > { %v793_v55 = vsel %vm606_vm0, %v761_v21, %v792_v26  ;;  %v1313_v47 = vsel %vm606_vm0, %v1312_v25, %v4854_v28  ;;  %v1438_v59 = vrot.slane %v1309_v22, 4  ;;  %v1449_v56 = vsel %vm606_vm0, %v1448_v46, %v1311_v29  ;;  %1579 = vrot.lane.b32.xlu2 %v4900_v58, %s4262_s17 }
 0x1e2   : > { %v791_v12 = vsel %vm606_vm0, %v790_v6, %v749_v41  ;;  %v801_v3 = vperm.slane %v793_v55, %v4601_v5  ;;  %v802_v61 = vrot.slane %v765_v0, 4  ;;  %v805_v52 = vsel %vm606_vm0, %v765_v0, %v804_v17 }
 0x1e3   : > { %v5168_v7 = vperm.slane %v791_v12, %v4601_v5  ;;  %v813_v57 = vperm.slane %v805_v52, %v4601_v5  ;;  %v1436_v19 = vrot.slane %v1313_v47, 4  ;;  %v1450_v50 = vrot.slane %v1311_v29, 4 }
 0x1e4   : > { %v803_v28 = vsel %vm606_vm0, %v802_v61, %v753_v14  ;;  %v818_v25 = vrot.slane %v801_v3, 4  ;;  %v5175_v46 = vsel %vm606_vm0, %v801_v3, %v820_v32  ;;  %v1455_v34 = vperm.slane %v1449_v56, %v4589_v51 }
 0x1e5   : > { %v5179_v40 = vperm.slane %v803_v28, %v4601_v5  ;;  %v814_v15 = vrot.slane %v5168_v7, 4  ;;  %v5184_v60 = vsel %vm606_vm0, %v5168_v7, %v816_v42  ;;  %v826_v23 = vrot.slane %v813_v57, 4 }
 0x1e6   : > { %v5187_v45 = vsel %vm606_vm0, %v818_v25, %v777_v30  ;;  %v5190_v8 = vsel %vm606_vm0, %v813_v57, %v828_v39  ;;  %v954_v44 = vrot.slane %v5175_v46, 4  ;;  %v956_v33 = vrot.slane %v5184_v60, 4 }
 0x1e7   : > { %v822_v48 = vrot.slane %v5179_v40, 4  ;;  %v5197_v32 = vsel %vm606_vm0, %v5179_v40, %v824_v43  ;;  %v5200_v24 = vsel %vm606_vm0, %v826_v23, %v789_v63  ;;  %v942_v37 = vrot.slane %v5187_v45, 4 }
 0x1e8   : > { %v957_v30 = vsel %vm606_vm0, %v5175_v46, %v956_v33  ;;  %v966_v41 = vrot.slane %v5200_v24, 4  ;;  %v978_v14 = vrot.slane %v5190_v8, 4  ;;  %v980_v54 = vrot.slane %v5197_v32, 4 }
 0x1e9   : > { %v5209_v42 = vperm.slane %v957_v30, %v4589_v51  ;;  %v1437_v39 = vsel %vm606_vm0, %v1436_v19, %v1309_v22  ;;  %v1461_v63 = vsel %vm606_vm0, %v1460_v2, %v5045_v10  ;;  %v1473_v21 = vsel %vm606_vm0, %v1472_v38, %v5033_v4  ;;  %1585 = vrot.lane.b32.xlu2 %v4900_v58, %s4261_s30 }
 0x1ea   : > { %v5222_v26 = vsel %vm606_vm0, %v5190_v8, %v980_v54  ;;  %v1443_v17 = vperm.slane %v1437_v39, %v4589_v51  ;;  %v1467_v27 = vperm.slane %v1461_v63, %v4589_v51  ;;  %v1479_v22 = vperm.slane %v1473_v21, %v4589_v51 }
 0x1eb   : > { %v1484_v43 = vrot.slane %v1455_v34, 4  ;;  %v937_v36 = vsel %vm606_vm0, %v4983_v13, %v936_v18  ;;  %v1439_v49 = vsel %vm606_vm0, %v1313_v47, %v1438_v59  ;;  %v1451_v4 = vsel %vm606_vm0, %v5016_v53, %v1450_v50 }
 0x1ec   : > { %v1486_v38 = vrot.slane %v1443_v17, 4  ;;  %v1508_v10 = vrot.slane %v1479_v22, 4  ;;  %v1510_v2 = vrot.slane %v1467_v27, 4  ;;  %3770 = vmatmul.msk.f32.vlgmr.msrb.gmra.mxu3 %vm2042_vm1, %v937_v36  ;;  %v1447_v0 = vperm.slane %v1439_v49, %v4589_v51 }
 0x1ed   : > { %v1485_v9 = vsel %vm606_vm0, %v1484_v43, %v1443_v17  ;;  %v1459_v6 = vperm.slane %v1451_v4, %v4589_v51  ;;  %v1471_v13 = vperm.slane %v5069_v35, %v4589_v51  ;;  %v1520_v18 = vrot.slane %v5058_v20, 4 }
 0x1ee   : > { %v1491_v53 = vperm.slane %v1485_v9, %v4601_v5  ;;  %v1509_v29 = vsel %vm606_vm0, %v1508_v10, %v1467_v27  ;;  %v1487_v55 = vsel %vm606_vm0, %v1455_v34, %v1486_v38  ;;  %v1511_v47 = vsel %vm606_vm0, %v1479_v22, %v1510_v2 }
 0x1ef   : > { %v1515_v59 = vperm.slane %v1509_v29, %v4601_v5  ;;  %v1495_v56 = vperm.slane %v1487_v55, %v4601_v5  ;;  %v1519_v12 = vperm.slane %v1511_v47, %v4601_v5  ;;  %v1496_v3 = vrot.slane %v1459_v6, 4 }
 0x1f0   : > { %v1534_v61 = vrot.slane %v1491_v53, 4  ;;  %v1521_v35 = vsel %vm606_vm0, %v1520_v18, %v1471_v13  ;;  %v1498_v52 = vrot.slane %v1447_v0, 4  ;;  %v1522_v57 = vrot.slane %v1471_v13, 4 }
 0x1f1   : > { %v1532_v19 = vrot.slane %v1515_v59, 4  ;;  %v1536_v50 = vrot.slane %v1519_v12, 4  ;;  %v1497_v28 = vsel %vm606_vm0, %v1496_v3, %v1447_v0  ;;  %v1527_v25 = vperm.slane %v1521_v35, %v4601_v5 }
 0x1f2   : > { %v1535_v34 = vsel %vm606_vm0, %v1515_v59, %v1534_v61  ;;  %v1503_v23 = vperm.slane %v1497_v28, %v4601_v5  ;;  %v1538_v33 = vrot.slane %v1495_v56, 4  ;;  %v1499_v30 = vsel %vm606_vm0, %v1459_v6, %v1498_v52 }
 0x1f3   : > { %v1533_v54 = vsel %vm606_vm0, %v1532_v19, %v1491_v53  ;;  %3777 = vmatpush.xpose.msk.msrb.mxu3 %vm2042_vm1, %v1535_v34  ;;  %v1537_v39 = vsel %vm606_vm0, %v1536_v50, %v1495_v56  ;;  %v1540_v63 = vrot.slane %v1527_v25, 4  ;;  %v1507_v21 = vperm.slane %v1499_v30, %v4601_v5 }
 0x1f4   : > { %3775 = vmatpush.xpose.msk.msrb.mxu2 %vm2042_vm1, %v1533_v54  ;;  %3779 = vmatpush.xpose.msk.msra.mxu0 %vm2042_vm1, %v1537_v39  ;;  %v1539_v17 = vsel %vm606_vm0, %v1519_v12, %v1538_v33  ;;  %v1523_v27 = vsel %vm606_vm0, %v5058_v20, %v1522_v57  ;;  %v941_v22 = vsel %vm606_vm0, %v5096_v1, %v940_v16  ;;  %v1542_v43 = vrot.slane %v1503_v23, 4 }
 0x1f5   : > { %v1541_v36 = vsel %vm606_vm0, %v1540_v63, %v1503_v23  ;;  %3781 = vmatpush.xpose.msk.msra.mxu1 %vm2042_vm1, %v1539_v17  ;;  %v1531_v49 = vperm.slane %v1523_v27, %v4601_v5  ;;  %v1546_v4 = vrot.slane %v1507_v21, 4  ;;  %3774 = vmatmul.msk.f32.vlgmr.msra.gmra.mxu3 %vm2042_vm1, %v941_v22  ;;  %v815_v20 = vsel %vm606_vm0, %v814_v15, %v5129_v11 }
 0x1f6   : > { %v1543_v62 = vsel %vm606_vm0, %v1527_v25, %v1542_v43  ;;  %v823_v1 = vsel %vm606_vm0, %v822_v48, %v5138_v31  ;;  %v943_v16 = vsel %vm606_vm0, %v942_v37, %v815_v20  ;;  %v944_v38 = vrot.slane %v815_v20, 4 }
 0x1f7   : > { %v1544_v10 = vrot.slane %v1531_v49, 4  ;;  %v1547_v2 = vsel %vm606_vm0, %v1531_v49, %v1546_v4  ;;  %3785 = vmatpush.xpose.msk.msra.mxu3 %vm2042_vm1, %v1543_v62  ;;  %v949_v11 = vperm.slane %v943_v16, %v4589_v51  ;;  %v955_v7 = vsel %vm606_vm0, %v954_v44, %v5184_v60 }
 0x1f8   : > { %3783 = vmatpush.xpose.msk.msra.mxu2 %vm2042_vm1, %v1541_v36  ;;  %v961_v31 = vperm.slane %v955_v7, %v4589_v51  ;;  %v967_v40 = vsel %vm606_vm0, %v966_v41, %v823_v1  ;;  %v968_v15 = vrot.slane %v823_v1, 4  ;;  %v979_v48 = vsel %vm606_vm0, %v978_v14, %v5197_v32 }
 0x1f9   : > { %3789 = vmatpush.xpose.msk.msrb.mxu1 %vm2042_vm1, %v1547_v2  ;;  %v1545_v37 = vsel %vm606_vm0, %v1544_v10, %v1507_v21  ;;  %v973_v46 = vperm.slane %v967_v40, %v4589_v51  ;;  %v985_v60 = vperm.slane %v979_v48, %v4589_v51  ;;  %v992_v44 = vrot.slane %v949_v11, 4 }
 0x1fa   : > { %3787 = vmatpush.xpose.msk.msrb.mxu0 %vm2042_vm1, %v1545_v37  ;;  %v990_v0 = vrot.slane %v961_v31, 4  ;;  %v945_v9 = vsel %vm606_vm0, %v5187_v45, %v944_v38  ;;  %v969_v41 = vsel %vm606_vm0, %v5200_v24, %v968_v15  ;;  %v989_v8 = vperm.slane %v5222_v26, %v4589_v51 }
 0x1fb   : > { %v1014_v32 = vrot.slane %v985_v60, 4  ;;  %v1016_v14 = vrot.slane %v973_v46, 4  ;;  %v993_v6 = vsel %vm606_vm0, %v961_v31, %v992_v44  ;;  %v953_v13 = vperm.slane %v945_v9, %v4589_v51 }
 0x1fc   : > { %v991_v18 = vsel %vm606_vm0, %v990_v0, %v949_v11  ;;  %v1001_v53 = vperm.slane %v993_v6, %v4601_v5  ;;  %v977_v29 = vperm.slane %v969_v41, %v4589_v51  ;;  %v1002_v45 = vrot.slane %v5209_v42, 4 }
 0x1fd   : > { %v997_v55 = vperm.slane %v991_v18, %v4601_v5  ;;  %v1015_v24 = vsel %vm606_vm0, %v1014_v32, %v973_v46  ;;  %v1017_v26 = vsel %vm606_vm0, %v985_v60, %v1016_v14  ;;  %v1026_v47 = vrot.slane %v989_v8, 4 }
 0x1fe   : > { %v1021_v59 = vperm.slane %v1015_v24, %v4601_v5  ;;  %v1025_v56 = vperm.slane %v1017_v26, %v4601_v5  ;;  %v1044_v12 = vrot.slane %v1001_v53, 4  ;;  %v1003_v3 = vsel %vm606_vm0, %v1002_v45, %v953_v13 }
 0x1ff   : > { %v1040_v61 = vrot.slane %v997_v55, 4  ;;  %v1027_v35 = vsel %vm606_vm0, %v1026_v47, %v977_v29  ;;  %v1004_v52 = vrot.slane %v953_v13, 4  ;;  %v1009_v25 = vperm.slane %v1003_v3, %v4601_v5 }
 0x200   : > { %v1038_v57 = vrot.slane %v1021_v59, 4  ;;  %v1042_v19 = vrot.slane %v1025_v56, 4  ;;  %v1045_v50 = vsel %vm606_vm0, %v1025_v56, %v1044_v12  ;;  %v1028_v23 = vrot.slane %v977_v29, 4 }
 0x201   : > { %v1041_v28 = vsel %vm606_vm0, %v1021_v59, %v1040_v61  ;;  %3782 = vmatmul.msk.f32.vlgmr.msra.gmra.mxu1 %vm2042_vm1, %v1045_v50  ;;  %v1005_v34 = vsel %vm606_vm0, %v5209_v42, %v1004_v52  ;;  %v1033_v54 = vperm.slane %v1027_v35, %v4601_v5  ;;  %v1048_v17 = vrot.slane %v1009_v25, 4 }
 0x202   : > { %v1039_v33 = vsel %vm606_vm0, %v1038_v57, %v997_v55  ;;  %3778 = vmatmul.msk.f32.vlgmr.msrb.gmra.mxu3 %vm2042_vm1, %v1041_v28  ;;  %v1043_v30 = vsel %vm606_vm0, %v1042_v19, %v1001_v53  ;;  %v1013_v39 = vperm.slane %v1005_v34, %v4601_v5  ;;  %v1029_v63 = vsel %vm606_vm0, %v989_v8, %v1028_v23 }
 0x203   : > { %3776 = vmatmul.msk.f32.vlgmr.msrb.gmra.mxu2 %vm2042_vm1, %v1039_v33  ;;  %3780 = vmatmul.msk.f32.vlgmr.msra.gmra.mxu0 %vm2042_vm1, %v1043_v30  ;;  %v1037_v21 = vperm.slane %v1029_v63, %v4601_v5  ;;  %v1046_v27 = vrot.slane %v1033_v54, 4  ;;  %v1049_v36 = vsel %vm606_vm0, %v1033_v54, %v1048_v17  ;;  %v1596_v2 = vrot.slane %v4900_v58, 4 }
 0x204   : > { %v1052_v42 = vrot.slane %v1013_v39, 4 }
 0x205   : > { %v1050_v22 = vrot.slane %v1037_v21, 4  ;;  %v1047_v49 = vsel %vm606_vm0, %v1046_v27, %v1009_v25 }
 0x206   : > { %v1053_v43 = vsel %vm606_vm0, %v1037_v21, %v1052_v42 }
 0x207   : > { %v1051_v4 = vsel %vm606_vm0, %v1050_v22, %v1013_v39 }
 0x209   : > { %3790 = vmatmul.msk.f32.vlgmr.msrb.gmra.mxu1 %vm2042_vm1, %v1053_v43 }
 0x20a   : > { %3786 = vmatmul.msk.f32.vlgmr.msra.gmra.mxu3 %vm2042_vm1, %v1049_v36 }
 0x20b   : > { %3784 = vmatmul.msk.f32.vlgmr.msra.gmra.mxu2 %vm2042_vm1, %v1047_v49  ;;  %3788 = vmatmul.msk.f32.vlgmr.msrb.gmra.mxu0 %vm2042_vm1, %v1051_v4 }
 0x21a   : > { %v1559_v62 = vpop.permute.xlu2 %1558 }
 0x21b   : > { %v1620_v38 = vrot.slane %v1559_v62, 4 }
 0x222   : > { %v1568_v11 = vpop.permute.xlu2 %1567 }
 0x223   : > { %v1630_v0 = vrot.slane %v1568_v11, 4 }
 0x22a   : > { %v5366_v55 = vpop.permute.xlu2 %1573 }
 0x231   : > { %v1550_v20 = vpop.permute.xlu0 %1549  ;;  %v1553_v1 = vpop.permute.xlu1 %1552 }
 0x232   : > { %v1608_v10 = vrot.slane %v1550_v20, 4  ;;  %v1594_v15 = vrot.slane %v1553_v1, 4  ;;  %v1597_v46 = vsel %vm606_vm0, %v1553_v1, %v1596_v2 }
 0x233   : > { %v1605_v14 = vperm.slane %v1597_v46, %v4589_v51  ;;  %v5381_v54 = vpop.permute.xlu2 %1582 }
 0x234   : > { %v1595_v32 = vsel %vm606_vm0, %v1594_v15, %v4900_v58 }
 0x235   : > { %v1601_v58 = vperm.slane %v1595_v32, %v4589_v51  ;;  %v1656_v12 = vrot.slane %v1605_v14, 4 }
 0x237   : > { %v1644_v35 = vrot.slane %v1601_v58, 4 }
 0x239   : > { %v1556_v16 = vpop.permute.xlu0 %1555 }
 0x23a   : > { %v1562_v7 = vpop.permute.xlu1 %1561  ;;  %v1606_v60 = vrot.slane %v1556_v16, 4  ;;  %v1609_v44 = vsel %vm606_vm0, %v1556_v16, %v1608_v10 }
 0x23b   : > { %v1632_v31 = vrot.slane %v1562_v7, 4  ;;  %v1617_v6 = vperm.slane %v1609_v44, %v4589_v51  ;;  %v1631_v29 = vsel %vm606_vm0, %v1630_v0, %v1562_v7 }
 0x23c   : > { %v1607_v53 = vsel %vm606_vm0, %v1606_v60, %v1550_v20  ;;  %v1637_v56 = vperm.slane %v1631_v29, %v4589_v51 }
 0x23d   : > { %v1633_v9 = vsel %vm606_vm0, %v1568_v11, %v1632_v31  ;;  %v1613_v47 = vperm.slane %v1607_v53, %v4589_v51  ;;  %v1654_v59 = vrot.slane %v1617_v6, 4  ;;  %v1657_v23 = vsel %vm606_vm0, %v1617_v6, %v1656_v12 }
 0x23e   : > { %v1641_v45 = vperm.slane %v1633_v9, %v4589_v51  ;;  %v1666_v25 = vrot.slane %v1637_v56, 4  ;;  %v1665_v17 = vperm.slane %v1657_v23, %v4601_v5  ;;  %v1720_v31 = vrot.slane %v5366_v55, 4 }
 0x23f   : > { %v1642_v50 = vrot.slane %v1613_v47, 4  ;;  %v1655_v28 = vsel %vm606_vm0, %v1654_v59, %v1605_v14  ;;  %v1645_v39 = vsel %vm606_vm0, %v1613_v47, %v1644_v35 }
 0x240   : > { %v1678_v3 = vrot.slane %v1641_v45, 4  ;;  %v1661_v63 = vperm.slane %v1655_v28, %v4601_v5  ;;  %v1653_v4 = vperm.slane %v1645_v39, %v4601_v5  ;;  %v1704_v11 = vrot.slane %v1665_v17, 4 }
 0x241   : > { %v1565_v40 = vpop.permute.xlu0 %1564  ;;  %v1643_v42 = vsel %vm606_vm0, %v1642_v50, %v1601_v58 }
 0x242   : > { %v1618_v48 = vrot.slane %v1565_v40, 4  ;;  %v1621_v37 = vsel %vm606_vm0, %v1565_v40, %v1620_v38  ;;  %v1571_v34 = vpop.permute.xlu1 %1570  ;;  %v1649_v1 = vperm.slane %v1643_v42, %v4601_v5  ;;  %v1700_v2 = vrot.slane %v1661_v63, 4 }
 0x243   : > { %v1629_v41 = vperm.slane %v1621_v37, %v4589_v51  ;;  %v1708_v38 = vrot.slane %v1571_v34, 4  ;;  %v1696_v40 = vrot.slane %v1653_v4, 4 }
 0x244   : > { %v1619_v13 = vsel %vm606_vm0, %v1618_v48, %v1559_v62  ;;  %v1692_v46 = vrot.slane %v1649_v1, 4 }
 0x245   : > { %v1625_v24 = vperm.slane %v1619_v13, %v4589_v51  ;;  %v1680_v26 = vrot.slane %v1629_v41, 4  ;;  %v1679_v33 = vsel %vm606_vm0, %v1678_v3, %v1629_v41  ;;  %v1580_v13 = vpop.permute.xlu2 %1579 }
 0x246   : > { %v1685_v43 = vperm.slane %v1679_v33, %v4601_v5  ;;  %v1718_v29 = vrot.slane %v1580_v13, 4 }
 0x247   : > { %v1668_v52 = vrot.slane %v1625_v24, 4  ;;  %v1681_v57 = vsel %vm606_vm0, %v1641_v45, %v1680_v26  ;;  %v1667_v22 = vsel %vm606_vm0, %v1666_v25, %v1625_v24  ;;  %v1721_v45 = vsel %vm606_vm0, %v1580_v13, %v1720_v31 }
 0x248   : > { %v1689_v30 = vperm.slane %v1681_v57, %v4601_v5  ;;  %v1673_v16 = vperm.slane %v1667_v22, %v4601_v5  ;;  %v1698_v7 = vrot.slane %v1685_v43, 4  ;;  %v1701_v32 = vsel %vm606_vm0, %v1685_v43, %v1700_v2 }
 0x249   : > { %v1669_v21 = vsel %vm606_vm0, %v1637_v56, %v1668_v52  ;;  %v1729_v47 = vperm.slane %v1721_v45, %v4589_v51  ;;  %v1719_v3 = vsel %vm606_vm0, %v1718_v29, %v5366_v55 }
 0x24a   : > { %v1677_v20 = vperm.slane %v1669_v21, %v4601_v5  ;;  %v1702_v62 = vrot.slane %v1689_v30, 4  ;;  %v1690_v60 = vrot.slane %v1673_v16, 4  ;;  %v1699_v41 = vsel %vm606_vm0, %v1698_v7, %v1661_v63 }
 0x24b   : > { %v5392_v36 = vpop.f32.mrf.mxu1  ;;  %v1577_v37 = vpop.permute.xlu1 %1576  ;;  %v1705_v14 = vsel %vm606_vm0, %v1689_v30, %v1704_v11  ;;  %v1725_v52 = vperm.slane %v1719_v3, %v4589_v51  ;;  %v1766_v57 = vrot.slane %v1729_v47, 4  ;;  %v1693_v25 = vsel %vm606_vm0, %v1673_v16, %v1692_v46 }
 0x24c   : > { %v2471_v10 = vsel %vm2042_vm1, %v5392_v36, -inf  ;;  %v1694_v15 = vrot.slane %v1677_v20, 4  ;;  %v1703_v48 = vsel %vm606_vm0, %v1702_v62, %v1665_v17  ;;  %v1706_v44 = vrot.slane %v1577_v37, 4 }
 0x24d   : > { %v1709_v0 = vsel %vm606_vm0, %v1577_v37, %v1708_v38  ;;  %v1697_v56 = vsel %vm606_vm0, %v1677_v20, %v1696_v40  ;;  %v1854_v12 = vrot.slane %v1705_v14, 4  ;;  %v1691_v28 = vsel %vm606_vm0, %v1690_v60, %v1649_v1 }
 0x24e   : > { %v5354_v8 = vpop.f32.mrf.mxu3  ;;  %v1717_v6 = vperm.slane %v1709_v0, %v4589_v51  ;;  %v1707_v53 = vsel %vm606_vm0, %v1706_v44, %v1571_v34  ;;  %v1695_v58 = vsel %vm606_vm0, %v1694_v15, %v1653_v4  ;;  %v1754_v23 = vrot.slane %v1725_v52, 4 }
 0x24f   : > { %v2459_v18 = vsel %vm2042_vm1, %v5354_v8, -inf  ;;  %v1713_v24 = vperm.slane %v1707_v53, %v4589_v51  ;;  %v1818_v34 = vrot.slane %v1695_v58, 4  ;;  %v1820_v30 = vrot.slane %v1691_v28, 4 }
 0x250   : > { %2460 = vmax.xlane.f32.xlu0 %v2459_v18  ;;  %v1842_v18 = vrot.slane %v1703_v48, 4  ;;  %v1768_v26 = vrot.slane %v1717_v6, 4  ;;  %v5432_v55 = vsel %vm606_vm0, %v1766_v57, %v1717_v6  ;;  %v1844_v39 = vrot.slane %v1699_v41, 4 }
 0x251   : > { %v1756_v35 = vrot.slane %v1713_v24, 4  ;;  %v1855_v63 = vsel %vm606_vm0, %v1854_v12, %v1701_v32  ;;  %v1856_v21 = vrot.slane %v1701_v32, 4  ;;  %v1819_v42 = vsel %vm606_vm0, %v1818_v34, %v1691_v28 }
 0x252   : > { %v1843_v50 = vsel %vm606_vm0, %v1842_v18, %v1699_v41  ;;  %v5437_v17 = vsel %vm606_vm0, %v1754_v23, %v1713_v24  ;;  %v1825_v22 = vperm.slane %v1819_v42, %v4589_v51  ;;  %v1830_v43 = vrot.slane %v1697_v56, 4 }
 0x253   : > { %v5429_v33 = vsel %vm606_vm0, %v1725_v52, %v1756_v35  ;;  %v1849_v4 = vperm.slane %v1843_v50, %v4589_v51  ;;  %v1861_v62 = vperm.slane %v1855_v63, %v4589_v51  ;;  %v1821_v16 = vsel %vm606_vm0, %v1695_v58, %v1820_v30 }
 0x254   : > { %v1831_v20 = vsel %vm606_vm0, %v1830_v43, %v1693_v25  ;;  %v1868_v1 = vrot.slane %v1825_v22, 4  ;;  %v1829_v2 = vperm.slane %v1821_v16, %v4589_v51  ;;  %v1845_v31 = vsel %vm606_vm0, %v1703_v48, %v1844_v39 }
 0x255   : > { %v5372_v61 = vpop.f32.mrf.mxu0  ;;  %v1837_v38 = vperm.slane %v1831_v20, %v4589_v51  ;;  %v1890_v11 = vrot.slane %v1861_v62, 4  ;;  %v1857_v40 = vsel %vm606_vm0, %v1705_v14, %v1856_v21  ;;  %v1853_v6 = vperm.slane %v1845_v31, %v4589_v51 }
 0x256   : > { %v2465_v19 = vsel %vm2042_vm1, %v5372_v61, -inf  ;;  %v1865_v13 = vperm.slane %v1857_v40, %v4589_v51  ;;  %v1880_v18 = vrot.slane %v1829_v2, 4 }
 0x257   : > { %2466 = vmax.xlane.f32.xlu2 %v2465_v19  ;;  %v5423_v19 = vsel %vm606_vm0, %v1729_v47, %v1768_v26  ;;  %v1869_v15 = vsel %vm606_vm0, %v1837_v38, %v1868_v1  ;;  %v1866_v46 = vrot.slane %v1837_v38, 4  ;;  %v1891_v32 = vsel %vm606_vm0, %v1890_v11, %v1849_v4 }
 0x258   : > { %v1877_v0 = vperm.slane %v1869_v15, %v4601_v5  ;;  %v1897_v14 = vperm.slane %v1891_v32, %v4601_v5  ;;  %v1904_v58 = vrot.slane %v1853_v6, 4 }
 0x259   : > { %v1867_v48 = vsel %vm606_vm0, %v1866_v46, %v1825_v22 }
 0x25a   : > { %v5388_v27 = vpop.f32.mrf.mxu3  ;;  %v1873_v29 = vperm.slane %v1867_v48, %v4601_v5  ;;  %v1920_v45 = vrot.slane %v1877_v0, 4  ;;  %v1914_v24 = vrot.slane %v1897_v14, 4  ;;  %v1905_v35 = vsel %vm606_vm0, %v1865_v13, %v1904_v58 }
 0x25b   : > { %v2462_v49 = vsel %vm2042_vm1, %v5388_v27, -inf  ;;  %v1913_v57 = vperm.slane %v1905_v35, %v4601_v5 }
 0x25c   : > { %2463 = vmax.xlane.f32.xlu1 %v2462_v49  ;;  %v1832_v49 = vrot.slane %v1693_v25, 4  ;;  %v1915_v52 = vsel %vm606_vm0, %v1914_v24, %v1873_v29  ;;  %v1916_v50 = vrot.slane %v1873_v29, 4 }
 0x25d   : > { %2653 = vmatpush.msrb.mxu2 %v1915_v52  ;;  %v1926_v30 = vrot.slane %v1913_v57, 4 }
 0x25e   : > { %v1833_v7 = vsel %vm606_vm0, %v1697_v56, %v1832_v49  ;;  %v1917_v39 = vsel %vm606_vm0, %v1897_v14, %v1916_v50 }
 0x25f   : > { %2472 = vmax.xlane.f32.xlu2 %v2471_v10  ;;  %v5405_v9 = vpop.f32.mrf.mxu2  ;;  %v1892_v10 = vrot.slane %v1849_v4, 4  ;;  %v1841_v60 = vperm.slane %v1833_v7, %v4589_v51  ;;  %2676 = vmatpush.msrb.mxu3 %v1917_v39 }
 0x260   : > { %v2477_v59 = vsel %vm2042_vm1, %v5405_v9, -inf }
 0x261   : > { %v1893_v37 = vsel %vm606_vm0, %v1861_v62, %v1892_v10  ;;  %v1881_v26 = vsel %vm606_vm0, %v1841_v60, %v1880_v18  ;;  %v1878_v47 = vrot.slane %v1841_v60, 4  ;;  %v5523_v18 = vpop.permute.xlu2 %1585 }
 0x262   : > { %v5452_v44 = vpop.f32.mrf.mxu3  ;;  %v1901_v41 = vperm.slane %v1893_v37, %v4601_v5  ;;  %v1889_v3 = vperm.slane %v1881_v26, %v4601_v5 }
 0x263   : > { %v1879_v28 = vsel %vm606_vm0, %v1878_v47, %v1829_v2 }
 0x264   : > { %v1918_v53 = vrot.slane %v1901_v41, 4  ;;  %v1921_v12 = vsel %vm606_vm0, %v1901_v41, %v1920_v45  ;;  %v1885_v25 = vperm.slane %v1879_v28, %v4601_v5  ;;  %v1928_v23 = vrot.slane %v1889_v3, 4 }
 0x265   : > { %2722 = vmatpush.msra.mxu1 %v1921_v12  ;;  %v1927_v22 = vsel %vm606_vm0, %v1926_v30, %v1889_v3  ;;  %v2468_v41 = vsel %vm2042_vm1, %v5452_v44, -inf }
 0x266   : > { %v1919_v56 = vsel %vm606_vm0, %v1918_v53, %v1877_v0  ;;  %v1929_v21 = vsel %vm606_vm0, %v1913_v57, %v1928_v23  ;;  %v1924_v42 = vrot.slane %v1885_v25, 4 }
 0x267   : > { %2478 = vmax.xlane.f32.xlu2 %v2477_v59  ;;  %v1902_v59 = vrot.slane %v1865_v13, 4  ;;  %2699 = vmatpush.msra.mxu0 %v1919_v56  ;;  %v3984_v13 = vld [vmem:[%s414_s1] sm:$0xff]  ;;  %s3808_s1 = sshll.u32 %s4341_s16, 3 }
 0x268   : > { %2814 = vmatpush.msrb.mxu1 %v1929_v21 }
 0x269   : > { %v1903_v34 = vsel %vm606_vm0, %v1902_v59, %v1853_v6  ;;  %2791 = vmatpush.msrb.mxu0 %v1927_v22 }
 0x26a   : > { %v1909_v63 = vperm.slane %v1903_v34, %v4601_v5 }
 0x26c   : > { %v1922_v43 = vrot.slane %v1909_v63, 4  ;;  %v1925_v4 = vsel %vm606_vm0, %v1909_v63, %v1924_v42 }
 0x26d   : > { %2768 = vmatpush.msra.mxu3 %v1925_v4 }
 0x26e   : > { %v1923_v20 = vsel %vm606_vm0, %v1922_v43, %v1885_v25 }
 0x26f   : > { %v5476_v49 = vpop.f32.mrf.mxu3  ;;  %2745 = vmatpush.msra.mxu2 %v1923_v20 }
 0x270   : > { %v2474_v6 = vsel %vm2042_vm1, %v5476_v49, -inf }
 0x278   : > { %v5488_v10 = vpop.f32.mrf.mxu3 }
 0x279   : > { %v2480_v14 = vsel %vm2042_vm1, %v5488_v10, -inf }
 0x27e   : > { %v5480_v62 = vpop.f32.mrf.mxu1 }
 0x27f   : > { %v2492_v1 = vsel %vm2042_vm1, %v5480_v62, -inf }
 0x280   : > { %v5484_v16 = vpop.f32.mrf.mxu0  ;;  %2493 = vmax.xlane.f32.xlu2 %v2492_v1 }
 0x281   : > { %v2489_v38 = vsel %vm2042_vm1, %v5484_v16, -inf }
 0x282   : > { %2490 = vmax.xlane.f32.xlu0 %v2489_v38 }
 0x285   : > { %v5502_v37 = vpop.f32.mrf.mxu3 }
 0x286   : > { %v5490_v2 = vpop.f32.mrf.mxu2  ;;  %v5492_v11 = vpop.f32.mrf.mxu1  ;;  %v2486_v60 = vsel %vm2042_vm1, %v5502_v37, -inf }
 0x287   : > { %v2504_v7 = vsel %vm2042_vm1, %v5492_v11, -inf  ;;  %v2483_v40 = vsel %vm2042_vm1, %v5490_v2, -inf }
 0x288   : > { %v5496_v31 = vpop.f32.mrf.mxu0  ;;  %2505 = vmax.xlane.f32.xlu2 %v2504_v7 }
 0x289   : > { %v2501_v15 = vsel %vm2042_vm1, %v5496_v31, -inf }
 0x28a   : > { %2484 = vmax.xlane.f32.xlu0 %v2483_v40  ;;  %2502 = vmax.xlane.f32.xlu1 %v2501_v15 }
 0x28d   : > { %v5512_v32 = vpop.f32.mrf.mxu3 }
 0x28e   : > { %v5504_v46 = vpop.f32.mrf.mxu2  ;;  %v2498_v48 = vsel %vm2042_vm1, %v5512_v32, -inf }
 0x28f   : > { %v2495_v0 = vsel %vm2042_vm1, %v5504_v46, -inf }
 0x290   : > { %2487 = vmax.xlane.f32.xlu2 %v2486_v60 }
 0x292   : > { %2496 = vmax.xlane.f32.xlu1 %v2495_v0  ;;  %2469 = vmax.xlane.f32.xlu0 %v2468_v41 }
 0x29a   : > { %2475 = vmax.xlane.f32.xlu1 %v2474_v6  ;;  %2499 = vmax.xlane.f32.xlu0 %v2498_v48 }
 0x2a2   : > { %2481 = vmax.xlane.f32.xlu1 %v2480_v14 }
 0x2a8   : > { %1588 = vrot.lane.b32.xlu2 %v3984_v13, %s4263_s19 }
 0x2c3   : > { %v2461_v53 = vpop.xlane.xlu0 %2460 }
 0x2c4   : > { %v2507_v29 = vsub.f32 %v5354_v8, %v2461_v53 }
 0x2c6   : > { %v2523_v45 = vmul.f32 1.442695, %v2507_v29 }
 0x2c8   : > { %3920 = vpow2.f32 %v2523_v45 }
 0x2ca   : > { %v2467_v58 = vpop.xlane.xlu2 %2466 }
 0x2cb   : > { %v2509_v24 = vsub.f32 %v5372_v61, %v2467_v58 }
 0x2cd   : > { %v2527_v26 = vmul.f32 1.442695, %v2509_v24 }
 0x2ce   : > { %v5527_v47 = vpop.eup %3920 }
 0x2cf   : > { %3922 = vpow2.f32 %v2527_v26  ;;  %v2555_v59 = vsel %vm2042_vm1, %v5527_v47, 0.0  ;;  %v2464_v12 = vpop.xlane.xlu1 %2463 }
 0x2d0   : > { %2556 = vadd.xlane.f32.xlu0 %v2555_v59  ;;  %v2508_v52 = vsub.f32 %v5388_v27, %v2464_v12 }
 0x2d2   : > { %v2473_v56 = vpop.xlane.xlu2 %2472  ;;  %v2525_v57 = vmul.f32 1.442695, %v2508_v52 }
 0x2d3   : > { %v2511_v3 = vsub.f32 %v5392_v36, %v2473_v56 }
 0x2d5   : > { %v5532_v35 = vpop.eup %3922  ;;  %v2531_v8 = vmul.f32 1.442695, %v2511_v3 }
 0x2d6   : > { %v2561_v61 = vsel %vm2042_vm1, %v5532_v35, 0.0 }
 0x2d7   : > { %3924 = vpow2.f32 %v2531_v8  ;;  %2562 = vadd.xlane.f32.xlu2 %v2561_v61 }
 0x2d8   : > { %3926 = vpow2.f32 %v2525_v57 }
 0x2da   : > { %v2479_v50 = vpop.xlane.xlu2 %2478 }
 0x2db   : > { %v2513_v25 = vsub.f32 %v5405_v9, %v2479_v50 }
 0x2dd   : > { %v5537_v28 = vpop.eup %3924  ;;  %v2535_v34 = vmul.f32 1.442695, %v2513_v25 }
 0x2de   : > { %v2567_v36 = vsel %vm2042_vm1, %v5537_v28, 0.0  ;;  %v5542_v23 = vpop.eup %3926 }
 0x2df   : > { %2568 = vadd.xlane.f32.xlu1 %v2567_v36  ;;  %3928 = vpow2.f32 %v2535_v34  ;;  %v2558_v27 = vsel %vm2042_vm1, %v5542_v23, 0.0 }
 0x2e4   : > { %1591 = vrot.lane.b32.xlu0 %v3984_v13, %s4264_s28 }
 0x2e5   : > { %v5547_v30 = vpop.eup %3928 }
 0x2e6   : > { %v2573_v39 = vsel %vm2042_vm1, %v5547_v30, 0.0 }
 0x2e7   : > { %2559 = vadd.xlane.f32.xlu1 %v2558_v27 }
 0x2ef   : > { %2574 = vadd.xlane.f32.xlu1 %v2573_v39 }
 0x2f3   : > { %v2494_v42 = vpop.xlane.xlu2 %2493 }
 0x2f5   : > { %v2491_v9 = vpop.xlane.xlu0 %2490 }
 0x2f6   : > { %v2517_v63 = vsub.f32 %v5484_v16, %v2491_v9 }
 0x2f8   : > { %v2543_v21 = vmul.f32 1.442695, %v2517_v63 }
 0x2fa   : > { %3930 = vpow2.f32 %v2543_v21 }
 0x2fb   : > { %v2506_v7 = vpop.xlane.xlu2 %2505 }
 0x2fc   : > { %v2522_v36 = vsub.f32 %v5492_v11, %v2506_v7 }
 0x2fd   : > { %v2485_v22 = vpop.xlane.xlu0 %2484  ;;  %v2503_v43 = vpop.xlane.xlu1 %2502 }
 0x2fe   : > { %v2515_v4 = vsub.f32 %v5490_v2, %v2485_v22  ;;  %v2521_v2 = vsub.f32 %v5496_v31, %v2503_v43  ;;  %v2553_v27 = vmul.f32 1.442695, %v2522_v36 }
 0x300   : > { %v5553_v20 = vpop.eup %3930  ;;  %v2539_v1 = vmul.f32 1.442695, %v2515_v4  ;;  %v2551_v14 = vmul.f32 1.442695, %v2521_v2 }
 0x301   : > { %v2585_v38 = vsel %vm2042_vm1, %v5553_v20, 0.0 }
 0x302   : > { %3932 = vpow2.f32 %v2539_v1  ;;  %2586 = vadd.xlane.f32.xlu2 %v2585_v38 }
 0x303   : > { %v2488_v13 = vpop.xlane.xlu2 %2487 }
 0x305   : > { %v2497_v40 = vpop.xlane.xlu1 %2496  ;;  %v2470_v15 = vpop.xlane.xlu0 %2469 }
 0x306   : > { %v2519_v16 = vsub.f32 %v5504_v46, %v2497_v40  ;;  %v2510_v60 = vsub.f32 %v5452_v44, %v2470_v15  ;;  %v2516_v44 = vsub.f32 %v5502_v37, %v2488_v13  ;;  %v2518_v37 = vsub.f32 %v5480_v62, %v2494_v42 }
 0x307   : > { %v1732_v40 = vrot.slane %v5381_v54, 4  ;;  %v1777_v13 = vperm.slane %v5423_v19, %v4601_v5 }
 0x308   : > { %v5559_v0 = vpop.eup %3932  ;;  %v2547_v41 = vmul.f32 1.442695, %v2519_v16  ;;  %v2529_v6 = vmul.f32 1.442695, %v2510_v60  ;;  %v2541_v26 = vmul.f32 1.442695, %v2516_v44 }
 0x309   : > { %v2579_v48 = vsel %vm2042_vm1, %v5559_v0, 0.0  ;;  %v2545_v50 = vmul.f32 1.442695, %v2518_v37 }
 0x30a   : > { %3934 = vpow2.f32 %v2547_v41  ;;  %2580 = vadd.xlane.f32.xlu1 %v2579_v48 }
 0x30b   : > { %3936 = vpow2.f32 %v2529_v6  ;;  %v1589_v22 = vpop.permute.xlu2 %1588 }
 0x30c   : > { %3938 = vpow2.f32 %v2551_v14  ;;  %v1730_v7 = vrot.slane %v1589_v22, 4  ;;  %v1733_v16 = vsel %vm606_vm0, %v1589_v22, %v1732_v40 }
 0x30d   : > { %v2476_v53 = vpop.xlane.xlu1 %2475  ;;  %v2500_v59 = vpop.xlane.xlu0 %2499  ;;  %v1741_v2 = vperm.slane %v1733_v16, %v4589_v51 }
 0x30e   : > { %v2512_v29 = vsub.f32 %v5476_v49, %v2476_v53  ;;  %v2520_v8 = vsub.f32 %v5512_v32, %v2500_v59  ;;  %v1731_v60 = vsel %vm606_vm0, %v1730_v7, %v5381_v54  ;;  %v1765_v54 = vperm.slane %v5429_v33, %v4601_v5 }
 0x30f   : > { %v1737_v48 = vperm.slane %v1731_v60, %v4589_v51  ;;  %v1761_v33 = vperm.slane %v5437_v17, %v4601_v5 }
 0x310   : > { %v5565_v46 = vpop.eup %3934  ;;  %v2533_v45 = vmul.f32 1.442695, %v2512_v29 }
 0x311   : > { %v5568_v58 = vpop.eup %3936  ;;  %v2591_v31 = vsel %vm2042_vm1, %v5565_v46, 0.0  ;;  %v1804_v22 = vrot.slane %v1761_v33, 4 }
 0x312   : > { %3940 = vpow2.f32 %v2533_v45  ;;  %2592 = vadd.xlane.f32.xlu1 %v2591_v31  ;;  %v2564_v24 = vsel %vm2042_vm1, %v5568_v58, 0.0  ;;  %v5575_v12 = vpop.eup %3938  ;;  %v1773_v31 = vperm.slane %v5432_v55, %v4601_v5  ;;  %v1808_v55 = vrot.slane %v1765_v54, 4 }
 0x313   : > { %2565 = vadd.xlane.f32.xlu0 %v2564_v24  ;;  %3942 = vpow2.f32 %v2541_v26  ;;  %v2597_v57 = vsel %vm2042_vm1, %v5575_v12, 0.0  ;;  %v1780_v24 = vrot.slane %v1737_v48, 4 }
 0x314   : > { %v1812_v17 = vrot.slane %v1773_v31, 4 }
 0x315   : > { %v2482_v49 = vpop.xlane.xlu1 %2481 }
 0x316   : > { %v2514_v56 = vsub.f32 %v5488_v10, %v2482_v49  ;;  %v2549_v10 = vmul.f32 1.442695, %v2520_v8  ;;  %v1816_v8 = vrot.slane %v1777_v13, 4 }
 0x318   : > { %v5578_v3 = vpop.eup %3940  ;;  %v2537_v52 = vmul.f32 1.442695, %v2514_v56 }
 0x319   : > { %v2570_v61 = vsel %vm2042_vm1, %v5578_v3, 0.0  ;;  %v5585_v25 = vpop.eup %3942 }
 0x31a   : > { %3944 = vpow2.f32 %v2537_v52  ;;  %2571 = vadd.xlane.f32.xlu1 %v2570_v61  ;;  %v2582_v34 = vsel %vm2042_vm1, %v5585_v25, 0.0 }
 0x31b   : > { %2598 = vadd.xlane.f32.xlu0 %v2597_v57  ;;  %3946 = vpow2.f32 %v2545_v50 }
 0x31c   : > { %3948 = vpow2.f32 %v2549_v10 }
 0x31d   : > { %3950 = vpow2.f32 %v2553_v27 }
 0x320   : > { %v5587_v62 = vpop.eup %3944 }
 0x321   : > { %v2576_v32 = vsel %vm2042_vm1, %v5587_v62, 0.0  ;;  %v5594_v39 = vpop.eup %3946 }
 0x322   : > { %2577 = vadd.xlane.f32.xlu2 %v2576_v32  ;;  %2583 = vadd.xlane.f32.xlu1 %v2582_v34  ;;  %v5596_v9 = vpop.eup %3948  ;;  %v2588_v63 = vsel %vm2042_vm1, %v5594_v39, 0.0 }
 0x323   : > { %v2594_v11 = vsel %vm2042_vm1, %v5596_v9, 0.0  ;;  %v5602_v21 = vpop.eup %3950 }
 0x324   : > { %v2600_v42 = vsel %vm2042_vm1, %v5602_v21, 0.0 }
 0x32a   : > { %2589 = vadd.xlane.f32.xlu2 %v2588_v63  ;;  %2595 = vadd.xlane.f32.xlu1 %v2594_v11 }
 0x332   : > { %2601 = vadd.xlane.f32.xlu2 %v2600_v42 }
 0x343   : > { %v2557_v43 = vpop.xlane.xlu0 %2556 }
 0x344   : > { %3952 = vrcp.f32 %v2557_v43 }
 0x34a   : > { %v3953_v4 = vpop.eup %3952  ;;  %v2563_v1 = vpop.xlane.xlu2 %2562 }
 0x34b   : > { %3954 = vrcp.f32 %v2563_v1  ;;  %v2619_v38 = vmul.f32 %v3953_v4, %v5527_v47  ;;  %v1744_v47 = vrot.slane %v5523_v18, 4 }
 0x34d   : > { %3791 = vmatmul.msk.f32.vlgmr.msrb.gmra.mxu2 %vm2042_vm1, %v2619_v38 }
 0x351   : > { %v3955_v15 = vpop.eup %3954 }
 0x352   : > { %v2621_v41 = vmul.f32 %v3955_v15, %v5532_v35  ;;  %v2569_v6 = vpop.xlane.xlu1 %2568  ;;  %v1792_v35 = vrot.slane %v1741_v2, 4 }
 0x353   : > { %3956 = vrcp.f32 %v2569_v6 }
 0x354   : > { %3793 = vmatmul.msk.f32.vlgmr.msra.gmra.mxu0 %vm2042_vm1, %v2621_v41 }
 0x356   : > { %v1592_v14 = vpop.permute.xlu0 %1591 }
 0x357   : > { %v1742_v53 = vrot.slane %v1592_v14, 4  ;;  %v1745_v29 = vsel %vm606_vm0, %v1592_v14, %v1744_v47 }
 0x358   : > { %v1753_v44 = vperm.slane %v1745_v29, %v4589_v51 }
 0x359   : > { %v3957_v45 = vpop.eup %3956  ;;  %v1743_v26 = vsel %vm606_vm0, %v1742_v53, %v5523_v18 }
 0x35a   : > { %v2623_v59 = vmul.f32 %v3957_v45, %v5537_v28  ;;  %v2560_v19 = vpop.xlane.xlu1 %2559  ;;  %v1749_v49 = vperm.slane %v1743_v26, %v4589_v51  ;;  %v1790_v56 = vrot.slane %v1753_v44, 4  ;;  %v1793_v37 = vsel %vm606_vm0, %v1753_v44, %v1792_v35 }
 0x35b   : > { %3958 = vrcp.f32 %v2560_v19  ;;  %v1801_v52 = vperm.slane %v1793_v37, %v4601_v5 }
 0x35c   : > { %3795 = vmatmul.msk.f32.vlgmr.msra.gmra.mxu2 %vm2042_vm1, %v2623_v59  ;;  %v1778_v61 = vrot.slane %v1749_v49, 4  ;;  %v1781_v18 = vsel %vm606_vm0, %v1749_v49, %v1780_v24  ;;  %v1791_v28 = vsel %vm606_vm0, %v1790_v56, %v1741_v2 }
 0x35d   : > { %v1789_v57 = vperm.slane %v1781_v18, %v4601_v5  ;;  %v1797_v50 = vperm.slane %v1791_v28, %v4601_v5  ;;  %v1814_v10 = vrot.slane %v1801_v52, 4  ;;  %v1817_v36 = vsel %vm606_vm0, %v1801_v52, %v1816_v8 }
 0x35e   : > { %v1779_v32 = vsel %vm606_vm0, %v1778_v61, %v1737_v48  ;;  %v1966_v34 = vrot.slane %v1817_v36, 4 }
 0x35f   : > { %v1785_v27 = vperm.slane %v1779_v32, %v4601_v5  ;;  %v1806_v63 = vrot.slane %v1789_v57, 4  ;;  %v1809_v11 = vsel %vm606_vm0, %v1789_v57, %v1808_v55  ;;  %v1810_v42 = vrot.slane %v1797_v50, 4 }
 0x360   : > { %v1813_v43 = vsel %vm606_vm0, %v1797_v50, %v1812_v17  ;;  %v1815_v4 = vsel %vm606_vm0, %v1814_v10, %v1777_v13  ;;  %v1942_v1 = vrot.slane %v1809_v11, 4 }
 0x361   : > { %v3959_v38 = vpop.eup %3958  ;;  %v1802_v7 = vrot.slane %v1785_v27, 4  ;;  %v1807_v40 = vsel %vm606_vm0, %v1806_v63, %v1765_v54  ;;  %v1811_v15 = vsel %vm606_vm0, %v1810_v42, %v1773_v31  ;;  %v1954_v16 = vrot.slane %v1815_v4, 4 }
 0x362   : > { %v2620_v60 = vmul.f32 %v3959_v38, %v5542_v23  ;;  %v1956_v41 = vrot.slane %v1811_v15, 4  ;;  %v1967_v6 = vsel %vm606_vm0, %v1966_v34, %v1813_v43  ;;  %v1968_v2 = vrot.slane %v1813_v43, 4  ;;  %v2575_v47 = vpop.xlane.xlu1 %2574 }
 0x363   : > { %3960 = vrcp.f32 %v2575_v47  ;;  %v1803_v48 = vsel %vm606_vm0, %v1802_v7, %v1761_v33  ;;  %v1805_v14 = vsel %vm606_vm0, %v1785_v27, %v1804_v22  ;;  %v1930_v13 = vrot.slane %v1807_v40, 4 }
 0x364   : > { %v1969_v53 = vsel %vm606_vm0, %v1817_v36, %v1968_v2  ;;  %3792 = vmatmul.msk.f32.vlgmr.msrb.gmra.mxu3 %vm2042_vm1, %v2620_v60  ;;  %v1932_v29 = vrot.slane %v1803_v48, 4  ;;  %v1943_v54 = vsel %vm606_vm0, %v1942_v1, %v1805_v14  ;;  %v1944_v35 = vrot.slane %v1805_v14, 4 }
 0x365   : > { %v1977_v23 = vperm.slane %v1969_v53, %v4589_v51  ;;  %v1931_v44 = vsel %vm606_vm0, %v1930_v13, %v1803_v48  ;;  %v1949_v45 = vperm.slane %v1943_v54, %v4589_v51  ;;  %v1955_v31 = vsel %vm606_vm0, %v1954_v16, %v1811_v15 }
 0x366   : > { %v1937_v24 = vperm.slane %v1931_v44, %v4589_v51  ;;  %v1961_v26 = vperm.slane %v1955_v31, %v4589_v51  ;;  %v1973_v59 = vperm.slane %v1967_v6, %v4589_v51  ;;  %v1933_v19 = vsel %vm606_vm0, %v1807_v40, %v1932_v29 }
 0x367   : > { %v1978_v49 = vrot.slane %v1949_v45, 4  ;;  %v1941_v56 = vperm.slane %v1933_v19, %v4589_v51  ;;  %v1945_v37 = vsel %vm606_vm0, %v1809_v11, %v1944_v35  ;;  %v1957_v33 = vsel %vm606_vm0, %v1815_v4, %v1956_v41 }
 0x368   : > { %v2002_v8 = vrot.slane %v1973_v59, 4  ;;  %v1980_v52 = vrot.slane %v1937_v24, 4  ;;  %v2004_v55 = vrot.slane %v1961_v26, 4  ;;  %v1953_v61 = vperm.slane %v1945_v37, %v4589_v51 }
 0x369   : > { %v3961_v18 = vpop.eup %3960  ;;  %v1979_v28 = vsel %vm606_vm0, %v1978_v49, %v1937_v24  ;;  %v1965_v57 = vperm.slane %v1957_v33, %v4589_v51  ;;  %v2014_v50 = vrot.slane %v1977_v23, 4  ;;  %v1992_v10 = vrot.slane %v1941_v56, 4 }
 0x36a   : > { %v2625_v36 = vmul.f32 %v3961_v18, %v5547_v30  ;;  %v1985_v17 = vperm.slane %v1979_v28, %v4601_v5  ;;  %v2003_v32 = vsel %vm606_vm0, %v2002_v8, %v1961_v26  ;;  %v1981_v34 = vsel %vm606_vm0, %v1949_v45, %v1980_v52 }
 0x36b   : > { %v2009_v27 = vperm.slane %v2003_v32, %v4601_v5  ;;  %v1989_v63 = vperm.slane %v1981_v34, %v4601_v5  ;;  %v2005_v11 = vsel %vm606_vm0, %v1973_v59, %v2004_v55  ;;  %v1990_v42 = vrot.slane %v1953_v61, 4 }
 0x36c   : > { %3797 = vmatmul.msk.f32.vlgmr.msrb.gmra.mxu0 %vm2042_vm1, %v2625_v36  ;;  %v2028_v22 = vrot.slane %v1985_v17, 4  ;;  %v2013_v43 = vperm.slane %v2005_v11, %v4601_v5  ;;  %v2015_v30 = vsel %vm606_vm0, %v2014_v50, %v1965_v57  ;;  %v1993_v4 = vsel %vm606_vm0, %v1953_v61, %v1992_v10 }
 0x36d   : > { %v2026_v1 = vrot.slane %v2009_v27, 4  ;;  %v1991_v38 = vsel %vm606_vm0, %v1990_v42, %v1941_v56  ;;  %v2021_v7 = vperm.slane %v2015_v30, %v4601_v5  ;;  %v2016_v60 = vrot.slane %v1965_v57, 4 }
 0x36e   : > { %v2029_v40 = vsel %vm606_vm0, %v2009_v27, %v2028_v22  ;;  %v2030_v15 = vrot.slane %v2013_v43, 4  ;;  %v1997_v16 = vperm.slane %v1991_v38, %v4601_v5  ;;  %v2001_v47 = vperm.slane %v1993_v4, %v4601_v5 }
 0x36f   : > { %v2027_v41 = vsel %vm606_vm0, %v2026_v1, %v1985_v17  ;;  %2860 = vmatpush.msrb.mxu3 %v2029_v40  ;;  %v2034_v6 = vrot.slane %v2021_v7, 4  ;;  %v2017_v48 = vsel %vm606_vm0, %v1977_v23, %v2016_v60  ;;  %v2032_v29 = vrot.slane %v1989_v63, 4 }
 0x370   : > { %2837 = vmatpush.msrb.mxu2 %v2027_v41  ;;  %v2031_v2 = vsel %vm606_vm0, %v2030_v15, %v1989_v63  ;;  %v2025_v13 = vperm.slane %v2017_v48, %v4601_v5  ;;  %v2036_v53 = vrot.slane %v1997_v16, 4  ;;  %v2040_v45 = vrot.slane %v2001_v47, 4 }
 0x371   : > { %2883 = vmatpush.msra.mxu0 %v2031_v2  ;;  %v2035_v14 = vsel %vm606_vm0, %v2034_v6, %v1997_v16  ;;  %v2033_v44 = vsel %vm606_vm0, %v2013_v43, %v2032_v29 }
 0x372   : > { %2929 = vmatpush.msra.mxu2 %v2035_v14  ;;  %v2038_v54 = vrot.slane %v2025_v13, 4  ;;  %v2037_v35 = vsel %vm606_vm0, %v2021_v7, %v2036_v53  ;;  %v2041_v23 = vsel %vm606_vm0, %v2025_v13, %v2040_v45 }
 0x374   : > { %v2039_v24 = vsel %vm606_vm0, %v2038_v54, %v2001_v47 }
 0x375   : > { %v2587_v31 = vpop.xlane.xlu2 %2586  ;;  %2975 = vmatpush.msrb.mxu0 %v2039_v24 }
 0x376   : > { %3962 = vrcp.f32 %v2587_v31 }
 0x37c   : > { %v3963_v26 = vpop.eup %3962 }
 0x37d   : > { %v2629_v59 = vmul.f32 %v3963_v26, %v5553_v20  ;;  %v2581_v19 = vpop.xlane.xlu1 %2580 }
 0x37e   : > { %3964 = vrcp.f32 %v2581_v19 }
 0x37f   : > { %3801 = vmatmul.msk.f32.vlgmr.msra.gmra.mxu0 %vm2042_vm1, %v2629_v59 }
 0x384   : > { %v3965_v49 = vpop.eup %3964 }
 0x385   : > { %v2627_v56 = vmul.f32 %v3965_v49, %v5559_v0  ;;  %v2593_v37 = vpop.xlane.xlu1 %2592 }
 0x386   : > { %3966 = vrcp.f32 %v2593_v37  ;;  %v2566_v33 = vpop.xlane.xlu0 %2565 }
 0x387   : > { %3799 = vmatmul.msk.f32.vlgmr.msrb.gmra.mxu2 %vm2042_vm1, %v2627_v56  ;;  %3968 = vrcp.f32 %v2566_v33 }
 0x38c   : > { %v3967_v8 = vpop.eup %3966 }
 0x38d   : > { %v3969_v52 = vpop.eup %3968  ;;  %v2631_v55 = vmul.f32 %v3967_v8, %v5565_v46  ;;  %v2572_v61 = vpop.xlane.xlu1 %2571 }
 0x38e   : > { %3970 = vrcp.f32 %v2572_v61  ;;  %v2622_v20 = vmul.f32 %v3969_v52, %v5568_v58  ;;  %v2599_v18 = vpop.xlane.xlu0 %2598 }
 0x38f   : > { %3803 = vmatmul.msk.f32.vlgmr.msra.gmra.mxu2 %vm2042_vm1, %v2631_v55  ;;  %3972 = vrcp.f32 %v2599_v18 }
 0x390   : > { %3794 = vmatmul.msk.f32.vlgmr.msra.gmra.mxu1 %vm2042_vm1, %v2622_v20 }
 0x391   : > { %2906 = vmatpush.msra.mxu1 %v2033_v44 }
 0x394   : > { %v3971_v0 = vpop.eup %3970 }
 0x395   : > { %v3973_v28 = vpop.eup %3972  ;;  %v2624_v57 = vmul.f32 %v3971_v0, %v5578_v3  ;;  %v2584_v50 = vpop.xlane.xlu1 %2583 }
 0x396   : > { %v2578_v10 = vpop.xlane.xlu2 %2577  ;;  %3974 = vrcp.f32 %v2584_v50  ;;  %v2633_v46 = vmul.f32 %v3973_v28, %v5575_v12 }
 0x397   : > { %3976 = vrcp.f32 %v2578_v10  ;;  %3796 = vmatmul.msk.f32.vlgmr.msra.gmra.mxu3 %vm2042_vm1, %v2624_v57 }
 0x398   : > { %2952 = vmatpush.msra.mxu3 %v2037_v35  ;;  %3805 = vmatmul.msk.f32.vlgmr.msrb.gmra.mxu0 %vm2042_vm1, %v2633_v46 }
 0x39c   : > { %v3975_v58 = vpop.eup %3974 }
 0x39d   : > { %v3977_v36 = vpop.eup %3976  ;;  %v2628_v17 = vmul.f32 %v3975_v58, %v5585_v25  ;;  %v2596_v34 = vpop.xlane.xlu1 %2595 }
 0x39e   : > { %v2590_v32 = vpop.xlane.xlu2 %2589  ;;  %v2626_v27 = vmul.f32 %v3977_v36, %v5587_v62 }
 0x39f   : > { %3978 = vrcp.f32 %v2590_v32  ;;  %3800 = vmatmul.msk.f32.vlgmr.msrb.gmra.mxu3 %vm2042_vm1, %v2628_v17 }
 0x3a0   : > { %3980 = vrcp.f32 %v2596_v34  ;;  %3798 = vmatmul.msk.f32.vlgmr.msrb.gmra.mxu1 %vm2042_vm1, %v2626_v27 }
 0x3a1   : > { %2998 = vmatpush.msrb.mxu1 %v2041_v23 }
 0x3a5   : > { %v3979_v12 = vpop.eup %3978 }
 0x3a6   : > { %v3981_v3 = vpop.eup %3980  ;;  %v2602_v63 = vpop.xlane.xlu2 %2601  ;;  %v2630_v11 = vmul.f32 %v3979_v12, %v5594_v39 }
 0x3a7   : > { %v2632_v42 = vmul.f32 %v3981_v3, %v5596_v9  ;;  %3982 = vrcp.f32 %v2602_v63 }
 0x3a8   : > { %3802 = vmatmul.msk.f32.vlgmr.msra.gmra.mxu1 %vm2042_vm1, %v2630_v11 }
 0x3a9   : > { %3804 = vmatmul.msk.f32.vlgmr.msra.gmra.mxu3 %vm2042_vm1, %v2632_v42 }
 0x3ad   : > { %v3983_v25 = vpop.eup %3982 }
 0x3ae   : > { %v2634_v62 = vmul.f32 %v3983_v25, %v5602_v21 }
 0x3b0   : > { %3806 = vmatmul.msk.f32.vlgmr.msrb.gmra.mxu1 %vm2042_vm1, %v2634_v62 }
 0x3d0   : > { %v2655_v22 = vpop.f32.mrf.mxu2 }
 0x3d1   : > { %v2701_v43 = vpop.f32.mrf.mxu0  ;;  %v3005_v1 = vrot.slane %v2655_v22, 4 }
 0x3d2   : > { %v3003_v9 = vrot.slane %v2701_v43, 4 }
 0x3d3   : > { %v3006_v16 = vsel %vm606_vm0, %v2701_v43, %v3005_v1 }
 0x3d4   : > { %v3004_v41 = vsel %vm606_vm0, %v3003_v9, %v2655_v22  ;;  %v3014_v2 = vperm.slane %v3006_v16, %v4589_v51 }
 0x3d5   : > { %v3010_v48 = vperm.slane %v3004_v41, %v4589_v51 }
 0x3d6   : > { %v3065_v35 = vrot.slane %v3014_v2, 4 }
 0x3d7   : > { %v3053_v24 = vrot.slane %v3010_v48, 4 }
 0x3df   : > { %v2747_v30 = vpop.f32.mrf.mxu2 }
 0x3e0   : > { %v3029_v53 = vrot.slane %v2747_v30, 4 }
 0x3e7   : > { %v2678_v38 = vpop.f32.mrf.mxu3 }
 0x3e8   : > { %v3017_v15 = vrot.slane %v2678_v38, 4 }
 0x3e9   : > { %v2793_v4 = vpop.f32.mrf.mxu0 }
 0x3ea   : > { %v3027_v47 = vrot.slane %v2793_v4, 4  ;;  %v3030_v45 = vsel %vm606_vm0, %v2793_v4, %v3029_v53 }
 0x3eb   : > { %v3038_v8 = vperm.slane %v3030_v45, %v4589_v51 }
 0x3ec   : > { %v3028_v44 = vsel %vm606_vm0, %v3027_v47, %v2747_v30 }
 0x3ed   : > { %v3034_v33 = vperm.slane %v3028_v44, %v4589_v51  ;;  %v3089_v34 = vrot.slane %v3038_v8, 4 }
 0x3ef   : > { %v3077_v32 = vrot.slane %v3034_v33, 4 }
 0x3fc   : > { %v2885_v60 = vpop.f32.mrf.mxu0 }
 0x3fd   : > { %v3115_v29 = vrot.slane %v2885_v60, 4 }
 0x40a   : > { %v2839_v40 = vpop.f32.mrf.mxu2 }
 0x40b   : > { %v3117_v54 = vrot.slane %v2839_v40, 4  ;;  %v3116_v31 = vsel %vm606_vm0, %v3115_v29, %v2839_v40 }
 0x40c   : > { %v5730_v52 = vperm.slane %v3116_v31, %v4589_v51 }
 0x40d   : > { %v2724_v7 = vpop.f32.mrf.mxu1  ;;  %v3118_v49 = vsel %vm606_vm0, %v2885_v60, %v3117_v54 }
 0x40e   : > { %v3015_v39 = vrot.slane %v2724_v7, 4  ;;  %v3018_v6 = vsel %vm606_vm0, %v2724_v7, %v3017_v15  ;;  %v5734_v0 = vperm.slane %v3118_v49, %v4589_v51  ;;  %v3165_v27 = vrot.slane %v5730_v52, 4 }
 0x40f   : > { %v3026_v13 = vperm.slane %v3018_v6, %v4589_v51 }
 0x410   : > { %v3016_v21 = vsel %vm606_vm0, %v3015_v39, %v2678_v38  ;;  %v3177_v30 = vrot.slane %v5734_v0, 4 }
 0x411   : > { %v3022_v14 = vperm.slane %v3016_v21, %v4589_v51  ;;  %v3063_v59 = vrot.slane %v3026_v13, 4  ;;  %v3066_v56 = vsel %vm606_vm0, %v3026_v13, %v3065_v35 }
 0x412   : > { %v2931_v23 = vpop.f32.mrf.mxu2  ;;  %v3074_v50 = vperm.slane %v3066_v56, %v4601_v5 }
 0x413   : > { %v3051_v26 = vrot.slane %v3022_v14, 4  ;;  %v3054_v55 = vsel %vm606_vm0, %v3022_v14, %v3053_v24  ;;  %v3141_v61 = vrot.slane %v2931_v23, 4  ;;  %v3064_v57 = vsel %vm606_vm0, %v3063_v59, %v3014_v2 }
 0x414   : > { %v3062_v46 = vperm.slane %v3054_v55, %v4601_v5  ;;  %v3070_v63 = vperm.slane %v3064_v57, %v4601_v5  ;;  %v3113_v1 = vrot.slane %v3074_v50, 4 }
 0x415   : > { %v2977_v19 = vpop.f32.mrf.mxu0  ;;  %v3052_v28 = vsel %vm606_vm0, %v3051_v26, %v3010_v48 }
 0x416   : > { %v3139_v18 = vrot.slane %v2977_v19, 4  ;;  %v3142_v17 = vsel %vm606_vm0, %v2977_v19, %v3141_v61  ;;  %v3058_v3 = vperm.slane %v3052_v28, %v4601_v5  ;;  %v3105_v4 = vrot.slane %v3062_v46, 4 }
 0x417   : > { %v5751_v43 = vperm.slane %v3142_v17, %v4589_v51  ;;  %v3109_v16 = vrot.slane %v3070_v63, 4 }
 0x418   : > { %v3140_v42 = vsel %vm606_vm0, %v3139_v18, %v2931_v23  ;;  %v3101_v6 = vrot.slane %v3058_v3, 4 }
 0x419   : > { %v5758_v15 = vperm.slane %v3140_v42, %v4589_v51  ;;  %v3201_v47 = vrot.slane %v5751_v43, 4 }
 0x41a   : > { %v2770_v37 = vpop.f32.mrf.mxu3 }
 0x41b   : > { %v3041_v20 = vrot.slane %v2770_v37, 4  ;;  %v3189_v44 = vrot.slane %v5758_v15, 4 }
 0x41d   : > { %v2816_v10 = vpop.f32.mrf.mxu1 }
 0x41e   : > { %v3039_v58 = vrot.slane %v2816_v10, 4  ;;  %v3042_v36 = vsel %vm606_vm0, %v2816_v10, %v3041_v20 }
 0x41f   : > { %v3050_v12 = vperm.slane %v3042_v36, %v4589_v51 }
 0x420   : > { %v3040_v11 = vsel %vm606_vm0, %v3039_v58, %v2770_v37 }
 0x421   : > { %v3046_v25 = vperm.slane %v3040_v11, %v4589_v51  ;;  %v3087_v62 = vrot.slane %v3050_v12, 4  ;;  %v3090_v22 = vsel %vm606_vm0, %v3050_v12, %v3089_v34 }
 0x422   : > { %v3098_v38 = vperm.slane %v3090_v22, %v4601_v5  ;;  %v2862_v7 = vpop.f32.mrf.mxu3 }
 0x423   : > { %v3075_v39 = vrot.slane %v3046_v25, 4  ;;  %v3078_v40 = vsel %vm606_vm0, %v3046_v25, %v3077_v32  ;;  %v3088_v9 = vsel %vm606_vm0, %v3087_v62, %v3038_v8  ;;  %v3129_v48 = vrot.slane %v2862_v7, 4 }
 0x424   : > { %v3086_v60 = vperm.slane %v3078_v40, %v4601_v5  ;;  %v3094_v41 = vperm.slane %v3088_v9, %v4601_v5  ;;  %v3111_v21 = vrot.slane %v3098_v38, 4  ;;  %v3114_v54 = vsel %vm606_vm0, %v3098_v38, %v3113_v1 }
 0x425   : > { %v3076_v2 = vsel %vm606_vm0, %v3075_v39, %v3034_v33  ;;  %v2908_v14 = vpop.f32.mrf.mxu1  ;;  %v3263_v49 = vrot.slane %v3114_v54, 4 }
 0x426   : > { %v3082_v13 = vperm.slane %v3076_v2, %v4601_v5  ;;  %v3103_v53 = vrot.slane %v3086_v60, 4  ;;  %v3107_v29 = vrot.slane %v3094_v41, 4  ;;  %v5767_v35 = vsel %vm606_vm0, %v3111_v21, %v3074_v50 }
 0x427   : > { %v3127_v45 = vrot.slane %v2908_v14, 4  ;;  %v3130_v31 = vsel %vm606_vm0, %v2908_v14, %v3129_v48  ;;  %v5775_v26 = vsel %vm606_vm0, %v3086_v60, %v3105_v4  ;;  %v3110_v59 = vsel %vm606_vm0, %v3094_v41, %v3109_v16 }
 0x428   : > { %v3099_v24 = vrot.slane %v3082_v13, 4  ;;  %v5772_v23 = vsel %vm606_vm0, %v3103_v53, %v3062_v46  ;;  %v5779_v19 = vsel %vm606_vm0, %v3107_v29, %v3070_v63  ;;  %v3138_v37 = vperm.slane %v3130_v31, %v4589_v51 }
 0x429   : > { %v3128_v56 = vsel %vm606_vm0, %v3127_v45, %v2862_v7  ;;  %v3251_v33 = vrot.slane %v5767_v35, 4  ;;  %v3227_v61 = vrot.slane %v5772_v23, 4  ;;  %v3265_v20 = vrot.slane %v3110_v59, 4 }
 0x42a   : > { %v3134_v8 = vperm.slane %v3128_v56, %v4589_v51  ;;  %v5786_v55 = vsel %vm606_vm0, %v3099_v24, %v3058_v3  ;;  %v3175_v18 = vrot.slane %v3138_v37, 4  ;;  %v3178_v28 = vsel %vm606_vm0, %v3138_v37, %v3177_v30 }
 0x42b   : > { %v3239_v50 = vrot.slane %v5775_v26, 4  ;;  %v3186_v58 = vperm.slane %v3178_v28, %v4601_v5  ;;  %v3102_v36 = vsel %vm606_vm0, %v3082_v13, %v3101_v6  ;;  %v3228_v3 = vsel %vm606_vm0, %v3227_v61, %v5786_v55 }
 0x42c   : > { %v2954_v57 = vpop.f32.mrf.mxu3  ;;  %v3163_v10 = vrot.slane %v3134_v8, 4  ;;  %v3166_v46 = vsel %vm606_vm0, %v3134_v8, %v3165_v27  ;;  %v3176_v32 = vsel %vm606_vm0, %v3175_v18, %v5734_v0  ;;  %v3253_v63 = vrot.slane %v5779_v19, 4 }
 0x42d   : > { %v3174_v17 = vperm.slane %v3166_v46, %v4601_v5  ;;  %v3153_v34 = vrot.slane %v2954_v57, 4  ;;  %v3000_v12 = vpop.f32.mrf.mxu1  ;;  %v5803_v27 = vperm.slane %v3176_v32, %v4601_v5  ;;  %v3266_v25 = vsel %vm606_vm0, %v3114_v54, %v3265_v20 }
 0x42e   : > { %v3164_v11 = vsel %vm606_vm0, %v3163_v10, %v5730_v52  ;;  %v3151_v42 = vrot.slane %v3000_v12, 4  ;;  %v3225_v62 = vrot.slane %v3186_v58, 4  ;;  %v3240_v0 = vsel %vm606_vm0, %v3239_v50, %v3102_v36 }
 0x42f   : > { %v3154_v22 = vsel %vm606_vm0, %v3000_v12, %v3153_v34  ;;  %v5809_v30 = vperm.slane %v3164_v11, %v4601_v5  ;;  %v3234_v52 = vperm.slane %v3228_v3, %v4589_v51  ;;  %v3217_v38 = vrot.slane %v3174_v17, 4 }
 0x430   : > { %v3152_v4 = vsel %vm606_vm0, %v3151_v42, %v2954_v57  ;;  %v3162_v1 = vperm.slane %v3154_v22, %v4589_v51  ;;  %v3221_v7 = vrot.slane %v5803_v27, 4  ;;  %v3252_v40 = vsel %vm606_vm0, %v3251_v33, %v5779_v19 }
 0x431   : > { %v3158_v39 = vperm.slane %v3152_v4, %v4589_v51  ;;  %v3246_v60 = vperm.slane %v3240_v0, %v4589_v51  ;;  %v3258_v41 = vperm.slane %v3252_v40, %v4589_v51  ;;  %v3264_v48 = vsel %vm606_vm0, %v3263_v49, %v3110_v59 }
 0x432   : > { %v3199_v9 = vrot.slane %v3162_v1, 4  ;;  %v3202_v16 = vsel %vm606_vm0, %v3162_v1, %v3201_v47  ;;  %v3277_v53 = vrot.slane %v3234_v52, 4  ;;  %v3270_v19 = vperm.slane %v3264_v48, %v4589_v51 }
 0x433   : > { %v3187_v21 = vrot.slane %v3158_v39, 4  ;;  %v3190_v6 = vsel %vm606_vm0, %v3158_v39, %v3189_v44  ;;  %v3210_v2 = vperm.slane %v3202_v16, %v4601_v5  ;;  %v3301_v29 = vrot.slane %v3258_v41, 4 }
 0x434   : > { %v3198_v14 = vperm.slane %v3190_v6, %v4601_v5  ;;  %v3200_v13 = vsel %vm606_vm0, %v3199_v9, %v5751_v43  ;;  %v3213_v43 = vrot.slane %v5809_v30, 4  ;;  %v3278_v18 = vsel %vm606_vm0, %v3246_v60, %v3277_v53 }
 0x435   : > { %v3188_v47 = vsel %vm606_vm0, %v3187_v21, %v5758_v15  ;;  %v3206_v54 = vperm.slane %v3200_v13, %v4601_v5  ;;  %v3223_v45 = vrot.slane %v3210_v2, 4  ;;  %v5831_v31 = vsel %vm606_vm0, %v3210_v2, %v3225_v62 }
 0x436   : > { %v3194_v44 = vperm.slane %v3188_v47, %v4601_v5  ;;  %v3215_v24 = vrot.slane %v3198_v14, 4  ;;  %v5835_v59 = vsel %vm606_vm0, %v3198_v14, %v3217_v38  ;;  %v3375_v56 = vrot.slane %v5831_v31, 4 }
 0x437   : > { %v3219_v49 = vrot.slane %v3206_v54, 4  ;;  %v3241_v15 = vrot.slane %v3102_v36, 4  ;;  %v5841_v33 = vsel %vm606_vm0, %v3206_v54, %v3221_v7  ;;  %v5844_v8 = vsel %vm606_vm0, %v3223_v45, %v3186_v58 }
 0x438   : > { %v3211_v37 = vrot.slane %v3194_v44, 4  ;;  %v3351_v61 = vrot.slane %v5835_v59, 4  ;;  %v5848_v20 = vsel %vm606_vm0, %v3215_v24, %v3174_v17  ;;  %v3302_v28 = vsel %vm606_vm0, %v3270_v19, %v3301_v29 }
 0x439   : > { %v3275_v57 = vrot.slane %v3246_v60, 4  ;;  %v3286_v50 = vperm.slane %v3278_v18, %v4601_v5  ;;  %v3310_v10 = vperm.slane %v3302_v28, %v4601_v5  ;;  %v3299_v46 = vrot.slane %v3270_v19, 4 }
 0x43a   : > { %v3229_v36 = vrot.slane %v5786_v55, 4  ;;  %v3242_v32 = vsel %vm606_vm0, %v5775_v26, %v3241_v15  ;;  %v3254_v17 = vsel %vm606_vm0, %v5767_v35, %v3253_v63  ;;  %v3274_v34 = vperm.slane %v3266_v25, %v4589_v51 }
 0x43b   : > { %v3276_v58 = vsel %vm606_vm0, %v3275_v57, %v3234_v52  ;;  %v3327_v12 = vrot.slane %v3310_v10, 4  ;;  %v3300_v11 = vsel %vm606_vm0, %v3299_v46, %v3258_v41  ;;  %v3329_v42 = vrot.slane %v3286_v50, 4 }
 0x43c   : > { %v5862_v3 = vperm.slane %v3276_v58, %v4601_v5  ;;  %v5866_v62 = vperm.slane %v3300_v11, %v4601_v5  ;;  %v3230_v55 = vsel %vm606_vm0, %v5772_v23, %v3229_v36  ;;  %v3250_v26 = vperm.slane %v3242_v32, %v4589_v51 }
 0x43d   : > { %v3262_v22 = vperm.slane %v3254_v17, %v4589_v51  ;;  %v3328_v35 = vsel %vm606_vm0, %v3327_v12, %v3286_v50  ;;  %v3330_v25 = vsel %vm606_vm0, %v3310_v10, %v3329_v42  ;;  %v3238_v0 = vperm.slane %v3230_v55, %v4589_v51 }
 0x43e   : > { %v3325_v63 = vrot.slane %v5862_v3, 4  ;;  %v3363_v4 = vrot.slane %v5844_v8, 4  ;;  %3456 = vrot.lane.b32.xlu0 %v3328_v35, %s4263_s19  ;;  %3460 = vrot.lane.b32.xlu2 %v3330_v25, %s4261_s30  ;;  %v3287_v1 = vrot.slane %v3250_v26, 4  ;;  %v3311_v23 = vrot.slane %v3274_v34, 4  ;;  %s4185_s30 = scalar_lea.hbm %s6013_s9, 16 }
 0x43f   : > { %v3313_v52 = vrot.slane %v3262_v22, 4  ;;  %v3289_v7 = vrot.slane %v3238_v0, 4  ;;  %v3212_v39 = vsel %vm606_vm0, %v3211_v37, %v5809_v30  ;;  %v3214_v40 = vsel %vm606_vm0, %v3194_v44, %v3213_v43 }
 0x440   : > { %v3326_v38 = vsel %vm606_vm0, %v5866_v62, %v3325_v63  ;;  %v3288_v9 = vsel %vm606_vm0, %v3287_v1, %v3238_v0  ;;  %v3312_v16 = vsel %vm606_vm0, %v3311_v23, %v3262_v22  ;;  %v3339_v41 = vrot.slane %v5848_v20, 4 }
 0x441   : > { %3452 = vrot.lane.b32.xlu1 %v3326_v38, %s4264_s28  ;;  %v3314_v60 = vsel %vm606_vm0, %v3274_v34, %v3313_v52  ;;  %v3220_v21 = vsel %vm606_vm0, %v3219_v49, %v5803_v27  ;;  %v3294_v6 = vperm.slane %v3288_v9, %v4601_v5  ;;  %v3318_v2 = vperm.slane %v3312_v16, %v4601_v5 }
 0x442   : > { %v3290_v30 = vsel %vm606_vm0, %v3250_v26, %v3289_v7  ;;  %v3322_v14 = vperm.slane %v3314_v60, %v4601_v5  ;;  %v3340_v13 = vsel %vm606_vm0, %v3339_v41, %v3212_v39  ;;  %v3352_v53 = vsel %vm606_vm0, %v3351_v61, %v3214_v40 }
 0x443   : > { %v3298_v48 = vperm.slane %v3290_v30, %v4601_v5  ;;  %v3331_v29 = vrot.slane %v3318_v2, 4  ;;  %v3333_v47 = vrot.slane %v3294_v6, 4  ;;  %v3341_v54 = vrot.slane %v3212_v39, 4 }
 0x444   : > { %v3346_v45 = vperm.slane %v3340_v13, %v4589_v51  ;;  %v3353_v44 = vrot.slane %v3214_v40, 4  ;;  %v3358_v24 = vperm.slane %v3352_v53, %v4589_v51  ;;  %v3364_v19 = vsel %vm606_vm0, %v3363_v4, %v3220_v21 }
 0x445   : > { %v3337_v27 = vrot.slane %v3298_v48, 4  ;;  %v3377_v43 = vrot.slane %v5841_v33, 4  ;;  %v3332_v49 = vsel %vm606_vm0, %v3331_v29, %v3294_v6  ;;  %v3334_v15 = vsel %vm606_vm0, %v3318_v2, %v3333_v47 }
 0x446   : > { %v3370_v37 = vperm.slane %v3364_v19, %v4589_v51  ;;  %3464 = vrot.lane.b32.xlu0 %v3332_v49, %s4258_s14  ;;  %v3376_v18 = vsel %vm606_vm0, %v3375_v56, %v5841_v33  ;;  %v3387_v28 = vrot.slane %v3358_v24, 4  ;;  %v3389_v57 = vrot.slane %v3346_v45, 4  ;;  %v3553_v19 = vld [vmem:[#allocation11 + $0x68] sm:$0xff]  ;;  %v3550_v49 = vld [vmem:[#allocation11 + $0x50] sm:$0xff] }
 0x447   : > { %v3338_v61 = vsel %vm606_vm0, %v3322_v14, %v3337_v27  ;;  %v3382_v50 = vperm.slane %v3376_v18, %v4589_v51  ;;  %v3342_v46 = vsel %vm606_vm0, %v5848_v20, %v3341_v54  ;;  %v3354_v36 = vsel %vm606_vm0, %v5835_v59, %v3353_v44  ;;  %v3555_v44 = vld [vmem:[#allocation11 + $0x78] sm:$0xff]  ;;  %v3546_v18 = vld [vmem:[#allocation11 + $0x30] sm:$0xff] }
 0x448   : > { %3476 = vrot.lane.b32.xlu2 %v3338_v61, %s4260_s12  ;;  %v3413_v10 = vrot.slane %v3370_v37, 4  ;;  %v3388_v58 = vsel %vm606_vm0, %v3387_v28, %v3346_v45  ;;  %v3390_v32 = vsel %vm606_vm0, %v3358_v24, %v3389_v57  ;;  %v3350_v56 = vperm.slane %v3342_v46, %v4589_v51  ;;  %v3554_v24 = vld [vmem:[#allocation11 + $0x70] sm:$0xff]  ;;  %3560 = vmatpush.msrb.mxu2 %v3555_v44  ;;  %v3547_v61 = vld [vmem:[#allocation11 + $0x38] sm:$0xff]  ;;  %v3545_v28 = vld [vmem:[#allocation11 + $0x28] sm:$0xff] }
 0x449   : > { %3468 = vrot.lane.b32.xlu1 %v3334_v15, %s4262_s17  ;;  %v3362_v33 = vperm.slane %v3354_v36, %v4589_v51  ;;  %v3335_v17 = vrot.slane %v3322_v14, 4  ;;  %v3411_v34 = vrot.slane %v3382_v50, 4  ;;  %v3398_v12 = vperm.slane %v3390_v32, %v4601_v5  ;;  %v3549_v15 = vld [vmem:[#allocation11 + $0x48] sm:$0xff]  ;;  %v3543_v46 = vld [vmem:[#allocation11 + $0x18] sm:$0xff]  ;;  %v3542_v36 = vld [vmem:[#allocation11 + $0x10] sm:$0xff] }
 0x44a   : > { %v3414_v11 = vsel %vm606_vm0, %v3382_v50, %v3413_v10  ;;  %v3365_v42 = vrot.slane %v3220_v21, 4  ;;  %v3378_v59 = vsel %vm606_vm0, %v5831_v31, %v3377_v43  ;;  %v3323_v26 = vrot.slane %v5866_v62, 4  ;;  %3561 = vmatpush.msrb.mxu2 %v3554_v24  ;;  %v3551_v43 = vld [vmem:[#allocation11 + $0x58] sm:$0xff]  ;;  %v3544_v10 = vld [vmem:[#allocation11 + $0x20] sm:$0xff]  ;;  %v3541_v32 = vld [vmem:[#allocation11 + $0x8] sm:$0xff] }
 0x44b   : > { %v3422_v20 = vperm.slane %v3414_v11, %v4601_v5  ;;  %v3399_v55 = vrot.slane %v3362_v33, 4  ;;  %v3394_v22 = vperm.slane %v3388_v58, %v4601_v5  ;;  %v3412_v35 = vsel %vm606_vm0, %v3411_v34, %v3370_v37  ;;  %v3548_v37 = vld [vmem:[#allocation11 + $0x40] sm:$0xff] }
 0x44c   : > { %v3386_v63 = vperm.slane %v3378_v59, %v4589_v51  ;;  %v3418_v25 = vperm.slane %v3412_v35, %v4601_v5  ;;  %v3366_v4 = vsel %vm606_vm0, %v5844_v8, %v3365_v42  ;;  %v3336_v23 = vsel %vm606_vm0, %v3335_v17, %v3298_v48  ;;  %3562 = vmatpush.msrb.mxu2 %v3553_v19  ;;  %v3540_v17 = vld [vmem:[#allocation11] sm:$0xff] }
 0x44d   : > { %v3439_v0 = vrot.slane %v3422_v20, 4  ;;  %v3400_v1 = vsel %vm606_vm0, %v3399_v55, %v3350_v56  ;;  %v3374_v31 = vperm.slane %v3366_v4, %v4589_v51  ;;  %v5943_v39 = vsel %vm606_vm0, %v3323_v26, %v5862_v3 }
 0x44e   : > { %v3423_v52 = vrot.slane %v3386_v63, 4  ;;  %3472 = vrot.lane.b32.xlu0 %v3336_v23, %s4259_s8  ;;  %v3435_v62 = vrot.slane %v3418_v25, 4  ;;  %v3406_v7 = vperm.slane %v3400_v1, %v4601_v5  ;;  %v3437_v40 = vrot.slane %v3394_v22, 4 }
 0x44f   : > { %v3440_v38 = vsel %vm606_vm0, %v3439_v0, %v3398_v12  ;;  %v3425_v9 = vrot.slane %v3374_v31, 4  ;;  %v3441_v60 = vrot.slane %v3398_v12, 4  ;;  %v3401_v6 = vrot.slane %v3350_v56, 4 }
 0x450   : > { %3488 = vrot.lane.b32.xlu2 %v3440_v38, %s4253_s21  ;;  %v3436_v8 = vsel %vm606_vm0, %v3435_v62, %v3394_v22  ;;  %v3424_v51 = vsel %vm606_vm0, %v3423_v52, %v3374_v31  ;;  %v3445_v16 = vrot.slane %v3406_v7, 4  ;;  %v3438_v21 = vsel %vm606_vm0, %v3418_v25, %v3437_v40  ;;  %s6052_s21 = sld [smem:[#allocation27_spill]] }
 0x451   : > { %3480 = vrot.lane.b32.xlu1 %v3436_v8, %s4256_s24  ;;  %v3430_v41 = vperm.slane %v3424_v51, %v4601_v5  ;;  %v3426_v2 = vsel %vm606_vm0, %v3386_v63, %v3425_v9  ;;  %v3442_v30 = vsel %vm606_vm0, %v3422_v20, %v3441_v60  ;;  %v3402_v13 = vsel %vm606_vm0, %v3362_v33, %v3401_v6 }
 0x452   : > { %v3434_v48 = vperm.slane %v3426_v2, %v4601_v5  ;;  %v3410_v53 = vperm.slane %v3402_v13, %v4601_v5  ;;  %v3552_v5 = vld [vmem:[#allocation11 + $0x60] sm:$0xff] }
 0x453   : > { %v3446_v3 = vsel %vm606_vm0, %v3430_v41, %v3445_v16  ;;  %v3443_v14 = vrot.slane %v3430_v41, 4  ;;  %3563 = vmatpush.msrb.mxu2 %v3552_v5 }
 0x454   : > { %v3447_v29 = vrot.slane %v3434_v48, 4  ;;  %v3449_v45 = vrot.slane %v3410_v53, 4 }
 0x455   : > { %v3444_v47 = vsel %vm606_vm0, %v3443_v14, %v3406_v7  ;;  %3564 = vmatpush.msrb.mxu2 %v3551_v43 }
 0x456   : > { %3484 = vrot.lane.b32.xlu0 %v3438_v21, %s4257_s22  ;;  %v3448_v54 = vsel %vm606_vm0, %v3447_v29, %v3410_v53  ;;  %v3450_v27 = vsel %vm606_vm0, %v3434_v48, %v3449_v45  ;;  %v3919_v9 = vld [vmem:[%s6052_s21] ss:$0 sm:$0xff]  ;;  %s3582_s22 = scalar_lea.sflag [#allocation4], %s4483_s15 }
 0x457   : > { %3565 = vmatpush.msrb.mxu2 %v3550_v49 }
 0x458   : > { %3500 = vrot.lane.b32.xlu2 %v3446_v3, %s4254_s3  ;;  %s474_s3 = scalar_lea.vmem [#allocation13], %s4486_s18 }
 0x459   : > { %3492 = vrot.lane.b32.xlu1 %v3442_v30, %s4250_s25  ;;  %3566 = vmatpush.msrb.mxu2 %v3549_v15 }
 0x45b   : > { %3567 = vmatpush.msrb.mxu2 %v3548_v37 }
 0x45d   : > { %3568 = vmatpush.msrb.mxu2 %v3547_v61 }
 0x45e   : > { %3496 = vrot.lane.b32.xlu0 %v3444_v47, %s4251_s26 }
 0x45f   : > { %3569 = vmatpush.msrb.mxu2 %v3546_v18 }
 0x461   : > { %3504 = vrot.lane.b32.xlu1 %v3448_v54, %s4255_s27  ;;  %3570 = vmatpush.msrb.mxu2 %v3545_v28  ;;  %s3594_s27 = sshll.u32 %s474_s3, 4  ;;  %s3595_s27 = int_to_ptr.vmem [resolvable:$true] %s3594_s27 }
 0x463   : > { %3571 = vmatpush.msrb.mxu2 %v3544_v10 }
 0x465   : > { %3572 = vmatpush.msrb.mxu2 %v3543_v46 }
 0x466   : > { %3508 = vrot.lane.b32.xlu0 %v3450_v27, %s4252_s23  ;;  %s3592_s23 = scalar_lea.hbm %s6013_s9, %s3808_s1 }
 0x467   : > { %3573 = vmatpush.msrb.mxu2 %v3542_v36  ;;  %s3596_s24 = sshll.u32 %s3592_s23, 4  ;;  %s3597_s24 = int_to_ptr.hbm [resolvable:$true] %s3596_s24 }
 0x468   : > { %s4179_s14 = sshra.s32 %s3597_s24, 4  ;;  %s4180_s14 = int_to_ptr.hbm [resolvable:$true] %s4179_s14 }
 0x469   : > { %3574 = vmatpush.msrb.mxu2 %v3541_v32  ;;  %s4181_s16 = scalar_lea.hbm %s4180_s14, 8  ;;  %p4186_p7 = scmp.lt.s32.totalorder %s4180_s14, %s6013_s9 }
 0x46a   : > { %p4182_p13 = scmp.ne.s32.totalorder %s4180_s14, %s4181_s16  ;;  %p4187_p10 = scmp.lt.s32.totalorder %s4185_s30, %s4181_s16 }
 0x46b   : > { %3575 = vmatpush.msrb.mxu2 %v3540_v17 }
 0x46c   : > { %p4183_p4 = pnand %p4182_p13, %p4386_p0  ;;  %p4188_p6 = por %p4187_p10, %p4186_p7 }
 0x46e   : > { %p4184_p1 = pneg %p4183_p4 }
 0x470   : > { %p4189_p11 = pnand %p4188_p6, %p4184_p1 }
 0x498   : > { %v3461_v58 = vpop.permute.xlu2 %3460 }
 0x4a2   : > { %v3477_v20 = vpop.permute.xlu2 %3476 }
 0x4aa   : > { %v3489_v25 = vpop.permute.xlu2 %3488 }
 0x4b0   : > { %v3457_v57 = vpop.permute.xlu0 %3456 }
 0x4b2   : > { %v3501_v38 = vpop.permute.xlu2 %3500 }
 0x4b3   : > { %v3453_v50 = vpop.permute.xlu1 %3452 }
 0x4b4   : > { %v3511_v33 = vsel %vm2042_vm1, %v5943_v39, %v3453_v50 }
 0x4b5   : > { %v3513_v12 = vsel %vm3512_vm2, %v3511_v33, %v3457_v57 }
 0x4b6   : > { %v3515_v11 = vsel %vm3514_vm3, %v3513_v12, %v3461_v58 }
 0x4b8   : > { %v3465_v56 = vpop.permute.xlu0 %3464 }
 0x4b9   : > { %v3517_v42 = vsel %vm3516_vm4, %v3515_v11, %v3465_v56 }
 0x4bb   : > { %v3469_v34 = vpop.permute.xlu1 %3468 }
 0x4bc   : > { %v3519_v26 = vsel %vm3518_vm5, %v3517_v42, %v3469_v34 }
 0x4c0   : > { %v3473_v59 = vpop.permute.xlu0 %3472 }
 0x4c1   : > { %v3521_v22 = vsel %vm3520_vm6, %v3519_v26, %v3473_v59 }
 0x4c2   : > { %v3523_v35 = vsel %vm3522_vm7, %v3521_v22, %v3477_v20 }
 0x4c3   : > { %v3481_v55 = vpop.permute.xlu1 %3480 }
 0x4c4   : > { %v3525_v0 = vsel %vm3524_vm8, %v3523_v35, %v3481_v55 }
 0x4c8   : > { %v3485_v63 = vpop.permute.xlu0 %3484 }
 0x4c9   : > { %v3527_v4 = vsel %vm3526_vm9, %v3525_v0, %v3485_v63 }
 0x4ca   : > { %v3529_v23 = vsel %vm3528_vm10, %v3527_v4, %v3489_v25 }
 0x4cb   : > { %v3493_v1 = vpop.permute.xlu1 %3492 }
 0x4cc   : > { %v3531_v52 = vsel %vm3530_vm11, %v3529_v23, %v3493_v1 }
 0x4d0   : > { %v3497_v31 = vpop.permute.xlu0 %3496 }
 0x4d1   : > { %v3533_v62 = vsel %vm3532_vm12, %v3531_v52, %v3497_v31 }
 0x4d2   : > { %v3535_v7 = vsel %vm3534_vm13, %v3533_v62, %v3501_v38 }
 0x4d3   : > { %v3505_v39 = vpop.permute.xlu1 %3504 }
 0x4d4   : > { %v3537_v8 = vsel %vm3536_vm14, %v3535_v7, %v3505_v39 }
 0x4d8   : > { %v3509_v40 = vpop.permute.xlu0 %3508 }
 0x4d9   : > { %v3539_v51 = vsel %vm3538_vm15, %v3537_v8, %v3509_v40 }
 0x4da   : > { %3576 = vmatmul.f32.vlgmr.msrb.gmra.mxu2 %v3539_v51 }
 0x55d   : > { %v3577_v16 = vpop.f32.mrf.mxu2 }
 0x55e   : > { %v3578_v60 = vadd.f32 %v3919_v9, %v3577_v16 }
 0x560   : > { %3580 = vst [vmem:[%s474_s3] sm:$0xff] %v3578_v60 }
 0x561   : > { %4192 = shalt.err (!%p4189_p11)
}
 0x562   : > { %3829 = dma.vmem_to_hbm [thread:$0]  (%p4386_p0), %s3595_s27, 128, %s3597_s24, %s3582_s22  }
 0x563 PF: > { %s6053_s15 = sld [smem:[#allocation19_spill]] }
 0x564   : > { %s6055_s28 = sld [smem:[#allocation20_spill]] }
 0x569   : > { %s3608_s1 = sand.u32 1, %s6053_s15  }
 0x56a   : > { %p6056_p12 = scmp.ge.s32.totalorder %s6055_s28, 2  ;;  %s3609_s29 = scalar_lea.sflag [#allocation4], %s3608_s1 }
 0x56c   : > { %p3852_p3 = pnand %p6056_p12, %p4392_p5 }
 0x56e   : > { %p3853_p8 = pneg %p3852_p3 }
 0x570   : > { %4226 = dma.done.wait (%p3853_p8), %s3609_s29, 128  }
 0x571   : > { %4228 = vsyncadd (%p3853_p8), %s3609_s29, 4294967168  ;;  %s6057_s12 = sld [smem:[#allocation21_spill]]  ;;  %s6059_s30 = smov %s4235_s10 }
 0x572   : > { %s6058_s25 = sld [smem:[#allocation22_spill]]  ;;  %s6060_s10 = smov %s4239_s11 }
 0x577   : > { %p27_p9 = scmp.ge.s32.totalorder %s6057_s12, 4  }
 0x578   : > { %s6061_s11 = smov %s6058_s25 }
 0x579   :  { %29 = sbr.rel (!%p27_p9) target bundleno = 13 (0xd), region = 137 }
 0x57e   :  { %3615 = vsyncpa [#allocation3], 1 }
 0x57f   :  { %3617 = vsyncpa [#allocation3 + $0x1], 1 }
 0x580   :  { %3618 = vsyncpa [#allocation6], 1 }
 0x581   :  { %3620 = vsyncpa [#allocation6 + $0x1], 1 }
 0x582   :  { %3621 = vsyncpa [#allocation9], 1 }
 0x583   :  { %3622 = vsyncpa [#allocation12], 1 }
 0x584   :  { %3623 = vsyncpa [#allocation4], 1 }
 0x585   :  { %3625 = vsyncpa [#allocation4 + $0x1], 1 }

</bundles_post_ra>
